<compile_context>
chip_gen: v5e
topology: v5e:2x2
jax: 0.10.0
libtpu: 0.0.40
codegen_flags: <defaults>
</compile_context>

<pallas_src>
import jax
import jax.numpy as jnp
import numpy as np
from jax.experimental import pallas as pl
from jax.experimental.pallas import tpu as pltpu

K, STRIDE, PAD = 4, 2, 1   # every ConvEnc: kernel 4, stride 2, padding 1
EPS = 1e-5                 # InstanceNorm2d default eps
SLOPE = 0.01               # LeakyReLU default negative_slope
LANE = 128                 # TPU lane width


def _round_up(x, m):
    return (x + m - 1) // m * m


# ---------------------------------------------------------------------------
# Fused kernel: per grid step = one sample through all 4 ConvEnc layers.
# refs = (x_ref, [S, B, R, Rbg, bw] * 4, o_ref)
#   x_ref : (1, H0, WC0p)        bf16   input in (H, W*C) layout, lane-padded
#   S     : (4, Ho, Hin)         bf16   0/1 height-tap row selection
#   B     : (4, Win*Cin(p), Wo*Cout) bf16  width taps folded with conv weights
#   R     : (Wo*Cout, Cout)      f32    per-channel fold (sum over wo)
#   Rbg   : (Cout, Wo*Cout)      f32    gamma-scaled broadcast back to lanes
#   bw    : (1, Wo*Cout)         f32    beta broadcast to lanes
#   o_ref : (1, H4, W4*C4)       f32    final activation in (H, W*C) layout
# ---------------------------------------------------------------------------
def _encoder_fused_kernel(*refs):
    x_ref = refs[0]
    o_ref = refs[-1]
    lrefs = refs[1:-1]
    n_layers = len(lrefs) // 5

    x = x_ref[0]                                     # (H0, WC0p) bf16
    a = None
    for li in range(n_layers):
        s_ref, b_ref, r_ref, rbg_ref, bw_ref = lrefs[5 * li:5 * li + 5]
        kk, ho, hin = s_ref.shape
        wcout, cout = r_ref.shape
        wo = wcout // cout

        # Conv(stride 2, k=4, pad 1) == sum over height taps of
        #   (row-select S_kh @ X) @ (width/weight fold B_kh), accumulated in f32.
        z = None
        for kh in range(kk):
            t = jnp.dot(s_ref[kh], x, preferred_element_type=jnp.float32)
            t = t.astype(jnp.bfloat16)               # exact: S is a 0/1 selection
            p = jnp.dot(t, b_ref[kh], preferred_element_type=jnp.float32)
            z = p if z is None else z + p            # (Ho, Wo*Cout) f32

        # InstanceNorm2d(affine=True), one-pass per-channel stats.
        inv_hw = 1.0 / float(ho * wo)
        s1 = jnp.sum(z, axis=0, keepdims=True)       # (1, Wo*Cout)
        s2 = jnp.sum(z * z, axis=0, keepdims=True)
        mean = jnp.dot(s1, r_ref[...],
                       preferred_element_type=jnp.float32) * inv_hw   # (1, Cout)
        ex2 = jnp.dot(s2, r_ref[...],
                      preferred_element_type=jnp.float32) * inv_hw
        var = jnp.maximum(ex2 - mean * mean, 0.0)    # biased var (PyTorch IN)
        inv = jax.lax.rsqrt(var + EPS)               # (1, Cout)

        # Broadcast per-channel scale/shift back to the (wo, c) lane layout.
        scale_w = jnp.dot(inv, rbg_ref[...],
                          preferred_element_type=jnp.float32)          # gamma/sqrt(var+eps)
        shift_w = bw_ref[...] - jnp.dot(mean * inv, rbg_ref[...],
                                        preferred_element_type=jnp.float32)
        a = z * scale_w + shift_w
        a = jnp.maximum(a, SLOPE * a)                # LeakyReLU(0.01)
        x = a.astype(jnp.bfloat16)                   # feeds next layer's matmuls

    o_ref[0] = a                                     # last layer kept in f32


# ---------------------------------------------------------------------------
# Parameter init (same parameterization as the PyTorch Encoder) and one-time
# preprocessing of the weights into the matmul constants the kernel consumes.
# ---------------------------------------------------------------------------
def init_encoder_params(key, chn):
    chans = [(3, chn), (chn, 2 * chn), (2 * chn, 4 * chn), (4 * chn, 8 * chn)]
    params = []
    for i, (c_in, c_out) in enumerate(chans):
        kw_, kg, kb = jax.random.split(jax.random.fold_in(key, i), 3)
        fan_in = c_in * K * K
        w = jax.random.normal(kw_, (c_out, c_in, K, K), jnp.float32) / jnp.sqrt(fan_in)
        gamma = 1.0 + 0.1 * jax.random.normal(kg, (c_out,), jnp.float32)
        beta = 0.1 * jax.random.normal(kb, (c_out,), jnp.float32)
        params.append((w, gamma, beta))
    return params


def build_encoder_constants(params, H0, W0):
    """Hoisted weight re-layout: build (S, B, R, Rbg, bw) per layer, ONCE."""
    consts = []
    Hin, Win = H0, W0
    Cin = int(params[0][0].shape[1])
    for li, (w, gamma, beta) in enumerate(params):
        w = np.asarray(w, np.float32)
        g = np.asarray(gamma, np.float32)
        b = np.asarray(beta, np.float32)
        Cout = w.shape[0]
        assert w.shape == (Cout, Cin, K, K)
        assert Hin % 2 == 0 and Win % 2 == 0
        Ho, Wo = Hin // 2, Win // 2
        WCin = Win * Cin
        # Only the very first layer's lane dim (W0*3) needs padding to 128; later
        # layers have Win*Cin constant and already lane-sized.
        WCin_p = _round_up(WCin, LANE) if li == 0 else WCin
        WCout = Wo * Cout

        # S[kh, ho, h] = 1 iff h == 2*ho - 1 + kh   (height tap, pad rows dropped)
        S = np.zeros((K, Ho, Hin), np.float32)
        for kh in range(K):
            for ho in range(Ho):
                h = 2 * ho - 1 + kh
                if 0 <= h < Hin:
                    S[kh, ho, h] = 1.0

        # B[kh, w*Cin+ci, wo*Cout+co] = W[co, ci, kh, w - 2*wo + 1]  (width fold)
        B = np.zeros((K, WCin_p, WCout), np.float32)
        for kh in range(K):
            for wo in range(Wo):
                for kw in range(K):
                    wcol = 2 * wo - 1 + kw
                    if 0 <= wcol < Win:
                        B[kh, wcol * Cin:(wcol + 1) * Cin,
                          wo * Cout:(wo + 1) * Cout] = w[:, :, kh, kw].T

        # Per-channel fold / broadcast helpers for the IN epilogue.
        R = np.tile(np.eye(Cout, dtype=np.float32), (Wo, 1))   # (WCout, Cout)
        Rbg = R.T * g[:, None]                                  # (Cout, WCout)
        bw = np.tile(b, Wo)[None, :]                            # (1, WCout)

        consts.append((
            jnp.asarray(S, jnp.bfloat16),
            jnp.asarray(B, jnp.bfloat16),
            jnp.asarray(R, jnp.float32),
            jnp.asarray(Rbg, jnp.float32),
            jnp.asarray(bw, jnp.float32),
        ))
        Hin, Win, Cin = Ho, Wo, Cout
    return tuple(consts)


# ---------------------------------------------------------------------------
# End-to-end jitted forward: one transpose in, one fused kernel, one transpose out.
# ---------------------------------------------------------------------------
@jax.jit
def encoder_forward(x, consts):
    """x: (N, 3, H, W) NCHW (PyTorch layout) -> (N, 8*chn, H/16, W/16) NCHW."""
    N, C0, H0, W0 = x.shape
    WC0p = consts[0][1].shape[1]        # padded W0*C0 lane width
    H4 = consts[-1][0].shape[1]         # final Ho
    WC4 = consts[-1][2].shape[0]        # final Wo*Cout
    C4 = consts[-1][2].shape[1]
    W4 = WC4 // C4

    xl = jnp.transpose(x, (0, 2, 3, 1)).reshape(N, H0, W0 * C0)      # (H, W*C) layout
    xl = jnp.pad(xl, ((0, 0), (0, 0), (0, WC0p - W0 * C0))).astype(jnp.bfloat16)

    in_specs = [pl.BlockSpec((1, H0, WC0p), lambda n: (n, 0, 0))]
    flat = []
    for (S, B, R, Rbg, bw) in consts:
        in_specs += [
            pl.BlockSpec(S.shape, lambda n: (0, 0, 0)),
            pl.BlockSpec(B.shape, lambda n: (0, 0, 0)),
            pl.BlockSpec(R.shape, lambda n: (0, 0)),
            pl.BlockSpec(Rbg.shape, lambda n: (0, 0)),
            pl.BlockSpec(bw.shape, lambda n: (0, 0)),
        ]
        flat += [S, B, R, Rbg, bw]

    # Advisory cost estimate (helps XLA schedule the surrounding transposes).
    flops = 0
    const_bytes = 0
    transcend = 0
    for (S, B, R, Rbg, bw) in consts:
        kk, ho, hin = S.shape
        _, wcin, wcout = B.shape
        flops += 2 * kk * ho * hin * wcin + 2 * kk * ho * wcin * wcout
        flops += 4 * wcout * R.shape[1] + 4 * R.shape[1] * wcout
        transcend += R.shape[1]
        for arr in (S, B, R, Rbg, bw):
            const_bytes += int(arr.size) * arr.dtype.itemsize
    cost = pl.CostEstimate(
        flops=int(N * flops),
        transcendentals=int(N * transcend),
        bytes_accessed=int(N * H0 * WC0p * 2 + const_bytes + N * H4 * WC4 * 4))

    out = pl.pallas_call(
        _encoder_fused_kernel,
        out_shape=jax.ShapeDtypeStruct((N, H4, WC4), jnp.float32),
        grid=(N,),
        in_specs=in_specs,
        out_specs=pl.BlockSpec((1, H4, WC4), lambda n: (n, 0, 0)),
        compiler_params=pltpu.CompilerParams(
            dimension_semantics=("parallel",)),   # batch shards across v7x's 2 TCs
        cost_estimate=cost,
    )(xl, *flat)

    y = out.reshape(N, H4, W4, C4)                # (N, H, W, C)
    return jnp.transpose(y, (0, 3, 1, 2))         # NCHW


# ---------------------------------------------------------------------------
# Pure-JAX reference (bf16 conv, f32 IN/LeakyReLU) for a structural self-check.
# ---------------------------------------------------------------------------
def encoder_forward_ref(x, params):
    y = x
    for (w, gamma, beta) in params:
        yc = jax.lax.conv_general_dilated(
            y.astype(jnp.bfloat16), w.astype(jnp.bfloat16),
            window_strides=(STRIDE, STRIDE), padding=((PAD, PAD), (PAD, PAD)),
            dimension_numbers=("NCHW", "OIHW", "NCHW"),
            preferred_element_type=jnp.float32)
        mean = jnp.mean(yc, axis=(2, 3), keepdims=True)
        var = jnp.mean(jnp.square(yc - mean), axis=(2, 3), keepdims=True)
        yn = (yc - mean) * jax.lax.rsqrt(var + EPS)
        yn = yn * gamma.reshape(1, -1, 1, 1) + beta.reshape(1, -1, 1, 1)
        y = jnp.maximum(yn, SLOPE * yn)
    return y


if __name__ == "__main__":
    chn = 8
    key = jax.random.PRNGKey(0)
    x = jax.random.normal(jax.random.fold_in(key, 100), (2, 3, 32, 32), jnp.float32)
    params = init_encoder_params(key, chn)
    consts = build_encoder_constants(params, 32, 32)   # one-time weight re-layout

    y = jax.block_until_ready(encoder_forward(x, consts))

    assert y.shape == (2, 8 * chn, 2, 2), y.shape
    assert bool(jnp.all(jnp.isfinite(y)))

    y_ref = jax.block_until_ready(jax.jit(encoder_forward_ref)(x, params))
    max_err = float(jnp.max(jnp.abs(y - y_ref)))
    assert max_err < 1e-1, f"max abs err vs reference: {max_err}"

    print("KERNEL_OK")
</pallas_src>

<mosaic_0001>
module attributes {stable_mosaic.version = 11 : i64} {
  func.func @_encoder_fused_kernel(%arg0: i32, %arg1: memref<1x32x128xbf16, #tpu.memory_space<vmem>>, %arg2: memref<4x16x32xbf16, #tpu.memory_space<vmem>>, %arg3: memref<4x128x128xbf16, #tpu.memory_space<vmem>>, %arg4: memref<128x8xf32, #tpu.memory_space<vmem>>, %arg5: memref<8x128xf32, #tpu.memory_space<vmem>>, %arg6: memref<1x128xf32, #tpu.memory_space<vmem>>, %arg7: memref<4x8x16xbf16, #tpu.memory_space<vmem>>, %arg8: memref<4x128x128xbf16, #tpu.memory_space<vmem>>, %arg9: memref<128x16xf32, #tpu.memory_space<vmem>>, %arg10: memref<16x128xf32, #tpu.memory_space<vmem>>, %arg11: memref<1x128xf32, #tpu.memory_space<vmem>>, %arg12: memref<4x4x8xbf16, #tpu.memory_space<vmem>>, %arg13: memref<4x128x128xbf16, #tpu.memory_space<vmem>>, %arg14: memref<128x32xf32, #tpu.memory_space<vmem>>, %arg15: memref<32x128xf32, #tpu.memory_space<vmem>>, %arg16: memref<1x128xf32, #tpu.memory_space<vmem>>, %arg17: memref<4x2x4xbf16, #tpu.memory_space<vmem>>, %arg18: memref<4x128x128xbf16, #tpu.memory_space<vmem>>, %arg19: memref<128x64xf32, #tpu.memory_space<vmem>>, %arg20: memref<64x128xf32, #tpu.memory_space<vmem>>, %arg21: memref<1x128xf32, #tpu.memory_space<vmem>>, %arg22: memref<1x2x128xf32, #tpu.memory_space<vmem>>) attributes {dimension_semantics = [#tpu.dimension_semantics<parallel>], iteration_bounds = array<i64: 2>, scalar_prefetch = 0 : i64, scratch_operands = 0 : i64, tpu.core_type = #tpu.core_type<tc>, window_params = [{transform_indices = @transform_0, window_bounds = array<i64: 1, 32, 128>}, {pipeline_mode = #tpu.pipeline_mode<synchronous>, transform_indices = @transform_1, window_bounds = array<i64: 4, 16, 32>}, {pipeline_mode = #tpu.pipeline_mode<synchronous>, transform_indices = @transform_2, window_bounds = array<i64: 4, 128, 128>}, {pipeline_mode = #tpu.pipeline_mode<synchronous>, transform_indices = @transform_3, window_bounds = array<i64: 128, 8>}, {pipeline_mode = #tpu.pipeline_mode<synchronous>, transform_indices = @transform_4, window_bounds = array<i64: 8, 128>}, {pipeline_mode = #tpu.pipeline_mode<synchronous>, transform_indices = @transform_5, window_bounds = array<i64: 1, 128>}, {pipeline_mode = #tpu.pipeline_mode<synchronous>, transform_indices = @transform_6, window_bounds = array<i64: 4, 8, 16>}, {pipeline_mode = #tpu.pipeline_mode<synchronous>, transform_indices = @transform_7, window_bounds = array<i64: 4, 128, 128>}, {pipeline_mode = #tpu.pipeline_mode<synchronous>, transform_indices = @transform_8, window_bounds = array<i64: 128, 16>}, {pipeline_mode = #tpu.pipeline_mode<synchronous>, transform_indices = @transform_9, window_bounds = array<i64: 16, 128>}, {pipeline_mode = #tpu.pipeline_mode<synchronous>, transform_indices = @transform_10, window_bounds = array<i64: 1, 128>}, {pipeline_mode = #tpu.pipeline_mode<synchronous>, transform_indices = @transform_11, window_bounds = array<i64: 4, 4, 8>}, {pipeline_mode = #tpu.pipeline_mode<synchronous>, transform_indices = @transform_12, window_bounds = array<i64: 4, 128, 128>}, {pipeline_mode = #tpu.pipeline_mode<synchronous>, transform_indices = @transform_13, window_bounds = array<i64: 128, 32>}, {pipeline_mode = #tpu.pipeline_mode<synchronous>, transform_indices = @transform_14, window_bounds = array<i64: 32, 128>}, {pipeline_mode = #tpu.pipeline_mode<synchronous>, transform_indices = @transform_15, window_bounds = array<i64: 1, 128>}, {pipeline_mode = #tpu.pipeline_mode<synchronous>, transform_indices = @transform_16, window_bounds = array<i64: 4, 2, 4>}, {pipeline_mode = #tpu.pipeline_mode<synchronous>, transform_indices = @transform_17, window_bounds = array<i64: 4, 128, 128>}, {pipeline_mode = #tpu.pipeline_mode<synchronous>, transform_indices = @transform_18, window_bounds = array<i64: 128, 64>}, {pipeline_mode = #tpu.pipeline_mode<synchronous>, transform_indices = @transform_19, window_bounds = array<i64: 64, 128>}, {pipeline_mode = #tpu.pipeline_mode<synchronous>, transform_indices = @transform_20, window_bounds = array<i64: 1, 128>}, {transform_indices = @transform_21, window_bounds = array<i64: 1, 2, 128>}]} {
    %c0 = arith.constant 0 : index
    %c0_0 = arith.constant 0 : index
    %c0_1 = arith.constant 0 : index
    %0 = vector.load %arg1[%c0, %c0_0, %c0_1] : memref<1x32x128xbf16, #tpu.memory_space<vmem>>, vector<1x32x128xbf16>
    %1 = vector.shape_cast %0 : vector<1x32x128xbf16> to vector<32x128xbf16>
    %c0_2 = arith.constant 0 : index
    %c0_3 = arith.constant 0 : index
    %c0_4 = arith.constant 0 : index
    %2 = vector.load %arg2[%c0_2, %c0_3, %c0_4] : memref<4x16x32xbf16, #tpu.memory_space<vmem>>, vector<1x16x32xbf16>
    %3 = vector.shape_cast %2 : vector<1x16x32xbf16> to vector<16x32xbf16>
    %cst = arith.constant dense<0.000000e+00> : vector<16x128xf32>
    %4 = tpu.matmul %3, %1, %cst {dimension_numbers = #tpu.dot_dimension_numbers<[1], [0], [0], [1], [0, 0, 1, 1], [], []>} : vector<16x32xbf16>, vector<32x128xbf16>, vector<16x128xf32> -> vector<16x128xf32>
    %5 = arith.truncf %4 : vector<16x128xf32> to vector<16x128xbf16>
    %c0_5 = arith.constant 0 : index
    %c0_6 = arith.constant 0 : index
    %c0_7 = arith.constant 0 : index
    %6 = vector.load %arg3[%c0_5, %c0_6, %c0_7] : memref<4x128x128xbf16, #tpu.memory_space<vmem>>, vector<1x128x128xbf16>
    %7 = vector.shape_cast %6 : vector<1x128x128xbf16> to vector<128x128xbf16>
    %cst_8 = arith.constant dense<0.000000e+00> : vector<16x128xf32>
    %8 = tpu.matmul %5, %7, %cst_8 {dimension_numbers = #tpu.dot_dimension_numbers<[1], [0], [0], [1], [0, 0, 1, 1], [], []>} : vector<16x128xbf16>, vector<128x128xbf16>, vector<16x128xf32> -> vector<16x128xf32>
    %c1 = arith.constant 1 : index
    %c0_9 = arith.constant 0 : index
    %c0_10 = arith.constant 0 : index
    %9 = vector.load %arg2[%c1, %c0_9, %c0_10] : memref<4x16x32xbf16, #tpu.memory_space<vmem>>, vector<1x16x32xbf16>
    %10 = vector.shape_cast %9 : vector<1x16x32xbf16> to vector<16x32xbf16>
    %cst_11 = arith.constant dense<0.000000e+00> : vector<16x128xf32>
    %11 = tpu.matmul %10, %1, %cst_11 {dimension_numbers = #tpu.dot_dimension_numbers<[1], [0], [0], [1], [0, 0, 1, 1], [], []>} : vector<16x32xbf16>, vector<32x128xbf16>, vector<16x128xf32> -> vector<16x128xf32>
    %12 = arith.truncf %11 : vector<16x128xf32> to vector<16x128xbf16>
    %c1_12 = arith.constant 1 : index
    %c0_13 = arith.constant 0 : index
    %c0_14 = arith.constant 0 : index
    %13 = vector.load %arg3[%c1_12, %c0_13, %c0_14] : memref<4x128x128xbf16, #tpu.memory_space<vmem>>, vector<1x128x128xbf16>
    %14 = vector.shape_cast %13 : vector<1x128x128xbf16> to vector<128x128xbf16>
    %cst_15 = arith.constant dense<0.000000e+00> : vector<16x128xf32>
    %15 = tpu.matmul %12, %14, %cst_15 {dimension_numbers = #tpu.dot_dimension_numbers<[1], [0], [0], [1], [0, 0, 1, 1], [], []>} : vector<16x128xbf16>, vector<128x128xbf16>, vector<16x128xf32> -> vector<16x128xf32>
    %16 = arith.addf %8, %15 : vector<16x128xf32>
    %c2 = arith.constant 2 : index
    %c0_16 = arith.constant 0 : index
    %c0_17 = arith.constant 0 : index
    %17 = vector.load %arg2[%c2, %c0_16, %c0_17] : memref<4x16x32xbf16, #tpu.memory_space<vmem>>, vector<1x16x32xbf16>
    %18 = vector.shape_cast %17 : vector<1x16x32xbf16> to vector<16x32xbf16>
    %cst_18 = arith.constant dense<0.000000e+00> : vector<16x128xf32>
    %19 = tpu.matmul %18, %1, %cst_18 {dimension_numbers = #tpu.dot_dimension_numbers<[1], [0], [0], [1], [0, 0, 1, 1], [], []>} : vector<16x32xbf16>, vector<32x128xbf16>, vector<16x128xf32> -> vector<16x128xf32>
    %20 = arith.truncf %19 : vector<16x128xf32> to vector<16x128xbf16>
    %c2_19 = arith.constant 2 : index
    %c0_20 = arith.constant 0 : index
    %c0_21 = arith.constant 0 : index
    %21 = vector.load %arg3[%c2_19, %c0_20, %c0_21] : memref<4x128x128xbf16, #tpu.memory_space<vmem>>, vector<1x128x128xbf16>
    %22 = vector.shape_cast %21 : vector<1x128x128xbf16> to vector<128x128xbf16>
    %cst_22 = arith.constant dense<0.000000e+00> : vector<16x128xf32>
    %23 = tpu.matmul %20, %22, %cst_22 {dimension_numbers = #tpu.dot_dimension_numbers<[1], [0], [0], [1], [0, 0, 1, 1], [], []>} : vector<16x128xbf16>, vector<128x128xbf16>, vector<16x128xf32> -> vector<16x128xf32>
    %24 = arith.addf %16, %23 : vector<16x128xf32>
    %c3 = arith.constant 3 : index
    %c0_23 = arith.constant 0 : index
    %c0_24 = arith.constant 0 : index
    %25 = vector.load %arg2[%c3, %c0_23, %c0_24] : memref<4x16x32xbf16, #tpu.memory_space<vmem>>, vector<1x16x32xbf16>
    %26 = vector.shape_cast %25 : vector<1x16x32xbf16> to vector<16x32xbf16>
    %cst_25 = arith.constant dense<0.000000e+00> : vector<16x128xf32>
    %27 = tpu.matmul %26, %1, %cst_25 {dimension_numbers = #tpu.dot_dimension_numbers<[1], [0], [0], [1], [0, 0, 1, 1], [], []>} : vector<16x32xbf16>, vector<32x128xbf16>, vector<16x128xf32> -> vector<16x128xf32>
    %28 = arith.truncf %27 : vector<16x128xf32> to vector<16x128xbf16>
    %c3_26 = arith.constant 3 : index
    %c0_27 = arith.constant 0 : index
    %c0_28 = arith.constant 0 : index
    %29 = vector.load %arg3[%c3_26, %c0_27, %c0_28] : memref<4x128x128xbf16, #tpu.memory_space<vmem>>, vector<1x128x128xbf16>
    %30 = vector.shape_cast %29 : vector<1x128x128xbf16> to vector<128x128xbf16>
    %cst_29 = arith.constant dense<0.000000e+00> : vector<16x128xf32>
    %31 = tpu.matmul %28, %30, %cst_29 {dimension_numbers = #tpu.dot_dimension_numbers<[1], [0], [0], [1], [0, 0, 1, 1], [], []>} : vector<16x128xbf16>, vector<128x128xbf16>, vector<16x128xf32> -> vector<16x128xf32>
    %32 = arith.addf %24, %31 : vector<16x128xf32>
    %cst_30 = arith.constant dense<0.000000e+00> : vector<128xf32>
    %33 = vector.multi_reduction <add>, %32, %cst_30 [0] : vector<16x128xf32> to vector<128xf32>
    %34 = vector.shape_cast %33 : vector<128xf32> to vector<1x128xf32>
    %35 = arith.mulf %32, %32 : vector<16x128xf32>
    %cst_31 = arith.constant dense<0.000000e+00> : vector<128xf32>
    %36 = vector.multi_reduction <add>, %35, %cst_31 [0] : vector<16x128xf32> to vector<128xf32>
    %37 = vector.shape_cast %36 : vector<128xf32> to vector<1x128xf32>
    %c0_32 = arith.constant 0 : index
    %c0_33 = arith.constant 0 : index
    %38 = vector.load %arg4[%c0_32, %c0_33] : memref<128x8xf32, #tpu.memory_space<vmem>>, vector<128x8xf32>
    %cst_34 = arith.constant dense<0.000000e+00> : vector<1x8xf32>
    %39 = tpu.matmul %34, %38, %cst_34 {dimension_numbers = #tpu.dot_dimension_numbers<[1], [0], [0], [1], [0, 0, 1, 1], [], []>} : vector<1x128xf32>, vector<128x8xf32>, vector<1x8xf32> -> vector<1x8xf32>
    %cst_35 = arith.constant 3.906250e-03 : f32
    %40 = vector.broadcast %cst_35 : f32 to vector<1x8xf32>
    %41 = arith.mulf %39, %40 : vector<1x8xf32>
    %c0_36 = arith.constant 0 : index
    %c0_37 = arith.constant 0 : index
    %42 = vector.load %arg4[%c0_36, %c0_37] : memref<128x8xf32, #tpu.memory_space<vmem>>, vector<128x8xf32>
    %cst_38 = arith.constant dense<0.000000e+00> : vector<1x8xf32>
    %43 = tpu.matmul %37, %42, %cst_38 {dimension_numbers = #tpu.dot_dimension_numbers<[1], [0], [0], [1], [0, 0, 1, 1], [], []>} : vector<1x128xf32>, vector<128x8xf32>, vector<1x8xf32> -> vector<1x8xf32>
    %cst_39 = arith.constant 3.906250e-03 : f32
    %44 = vector.broadcast %cst_39 : f32 to vector<1x8xf32>
    %45 = arith.mulf %43, %44 : vector<1x8xf32>
    %46 = arith.mulf %41, %41 : vector<1x8xf32>
    %47 = arith.subf %45, %46 : vector<1x8xf32>
    %cst_40 = arith.constant 0.000000e+00 : f32
    %48 = vector.broadcast %cst_40 : f32 to vector<1x8xf32>
    %49 = arith.maximumf %47, %48 : vector<1x8xf32>
    %cst_41 = arith.constant 9.99999974E-6 : f32
    %50 = vector.broadcast %cst_41 : f32 to vector<1x8xf32>
    %51 = arith.addf %49, %50 : vector<1x8xf32>
    %52 = math.rsqrt %51 : vector<1x8xf32>
    %c0_42 = arith.constant 0 : index
    %c0_43 = arith.constant 0 : index
    %53 = vector.load %arg5[%c0_42, %c0_43] : memref<8x128xf32, #tpu.memory_space<vmem>>, vector<8x128xf32>
    %cst_44 = arith.constant dense<0.000000e+00> : vector<1x128xf32>
    %54 = tpu.matmul %52, %53, %cst_44 {dimension_numbers = #tpu.dot_dimension_numbers<[1], [0], [0], [1], [0, 0, 1, 1], [], []>} : vector<1x8xf32>, vector<8x128xf32>, vector<1x128xf32> -> vector<1x128xf32>
    %c0_45 = arith.constant 0 : index
    %c0_46 = arith.constant 0 : index
    %55 = vector.load %arg6[%c0_45, %c0_46] : memref<1x128xf32, #tpu.memory_space<vmem>>, vector<1x128xf32>
    %56 = arith.mulf %41, %52 : vector<1x8xf32>
    %c0_47 = arith.constant 0 : index
    %c0_48 = arith.constant 0 : index
    %57 = vector.load %arg5[%c0_47, %c0_48] : memref<8x128xf32, #tpu.memory_space<vmem>>, vector<8x128xf32>
    %cst_49 = arith.constant dense<0.000000e+00> : vector<1x128xf32>
    %58 = tpu.matmul %56, %57, %cst_49 {dimension_numbers = #tpu.dot_dimension_numbers<[1], [0], [0], [1], [0, 0, 1, 1], [], []>} : vector<1x8xf32>, vector<8x128xf32>, vector<1x128xf32> -> vector<1x128xf32>
    %59 = arith.subf %55, %58 : vector<1x128xf32>
    %60 = vector.broadcast %54 : vector<1x128xf32> to vector<16x128xf32>
    %61 = arith.mulf %32, %60 : vector<16x128xf32>
    %62 = vector.broadcast %59 : vector<1x128xf32> to vector<16x128xf32>
    %63 = arith.addf %61, %62 : vector<16x128xf32>
    %cst_50 = arith.constant 0.00999999977 : f32
    %64 = vector.broadcast %cst_50 : f32 to vector<16x128xf32>
    %65 = arith.mulf %64, %63 : vector<16x128xf32>
    %66 = arith.maximumf %63, %65 : vector<16x128xf32>
    %67 = arith.truncf %66 : vector<16x128xf32> to vector<16x128xbf16>
    %c0_51 = arith.constant 0 : index
    %c0_52 = arith.constant 0 : index
    %c0_53 = arith.constant 0 : index
    %68 = vector.load %arg7[%c0_51, %c0_52, %c0_53] : memref<4x8x16xbf16, #tpu.memory_space<vmem>>, vector<1x8x16xbf16>
    %69 = vector.shape_cast %68 : vector<1x8x16xbf16> to vector<8x16xbf16>
    %cst_54 = arith.constant dense<0.000000e+00> : vector<8x128xf32>
    %70 = tpu.matmul %69, %67, %cst_54 {dimension_numbers = #tpu.dot_dimension_numbers<[1], [0], [0], [1], [0, 0, 1, 1], [], []>} : vector<8x16xbf16>, vector<16x128xbf16>, vector<8x128xf32> -> vector<8x128xf32>
    %71 = arith.truncf %70 : vector<8x128xf32> to vector<8x128xbf16>
    %c0_55 = arith.constant 0 : index
    %c0_56 = arith.constant 0 : index
    %c0_57 = arith.constant 0 : index
    %72 = vector.load %arg8[%c0_55, %c0_56, %c0_57] : memref<4x128x128xbf16, #tpu.memory_space<vmem>>, vector<1x128x128xbf16>
    %73 = vector.shape_cast %72 : vector<1x128x128xbf16> to vector<128x128xbf16>
    %cst_58 = arith.constant dense<0.000000e+00> : vector<8x128xf32>
    %74 = tpu.matmul %71, %73, %cst_58 {dimension_numbers = #tpu.dot_dimension_numbers<[1], [0], [0], [1], [0, 0, 1, 1], [], []>} : vector<8x128xbf16>, vector<128x128xbf16>, vector<8x128xf32> -> vector<8x128xf32>
    %c1_59 = arith.constant 1 : index
    %c0_60 = arith.constant 0 : index
    %c0_61 = arith.constant 0 : index
    %75 = vector.load %arg7[%c1_59, %c0_60, %c0_61] : memref<4x8x16xbf16, #tpu.memory_space<vmem>>, vector<1x8x16xbf16>
    %76 = vector.shape_cast %75 : vector<1x8x16xbf16> to vector<8x16xbf16>
    %cst_62 = arith.constant dense<0.000000e+00> : vector<8x128xf32>
    %77 = tpu.matmul %76, %67, %cst_62 {dimension_numbers = #tpu.dot_dimension_numbers<[1], [0], [0], [1], [0, 0, 1, 1], [], []>} : vector<8x16xbf16>, vector<16x128xbf16>, vector<8x128xf32> -> vector<8x128xf32>
    %78 = arith.truncf %77 : vector<8x128xf32> to vector<8x128xbf16>
    %c1_63 = arith.constant 1 : index
    %c0_64 = arith.constant 0 : index
    %c0_65 = arith.constant 0 : index
    %79 = vector.load %arg8[%c1_63, %c0_64, %c0_65] : memref<4x128x128xbf16, #tpu.memory_space<vmem>>, vector<1x128x128xbf16>
    %80 = vector.shape_cast %79 : vector<1x128x128xbf16> to vector<128x128xbf16>
    %cst_66 = arith.constant dense<0.000000e+00> : vector<8x128xf32>
    %81 = tpu.matmul %78, %80, %cst_66 {dimension_numbers = #tpu.dot_dimension_numbers<[1], [0], [0], [1], [0, 0, 1, 1], [], []>} : vector<8x128xbf16>, vector<128x128xbf16>, vector<8x128xf32> -> vector<8x128xf32>
    %82 = arith.addf %74, %81 : vector<8x128xf32>
    %c2_67 = arith.constant 2 : index
    %c0_68 = arith.constant 0 : index
    %c0_69 = arith.constant 0 : index
    %83 = vector.load %arg7[%c2_67, %c0_68, %c0_69] : memref<4x8x16xbf16, #tpu.memory_space<vmem>>, vector<1x8x16xbf16>
    %84 = vector.shape_cast %83 : vector<1x8x16xbf16> to vector<8x16xbf16>
    %cst_70 = arith.constant dense<0.000000e+00> : vector<8x128xf32>
    %85 = tpu.matmul %84, %67, %cst_70 {dimension_numbers = #tpu.dot_dimension_numbers<[1], [0], [0], [1], [0, 0, 1, 1], [], []>} : vector<8x16xbf16>, vector<16x128xbf16>, vector<8x128xf32> -> vector<8x128xf32>
    %86 = arith.truncf %85 : vector<8x128xf32> to vector<8x128xbf16>
    %c2_71 = arith.constant 2 : index
    %c0_72 = arith.constant 0 : index
    %c0_73 = arith.constant 0 : index
    %87 = vector.load %arg8[%c2_71, %c0_72, %c0_73] : memref<4x128x128xbf16, #tpu.memory_space<vmem>>, vector<1x128x128xbf16>
    %88 = vector.shape_cast %87 : vector<1x128x128xbf16> to vector<128x128xbf16>
    %cst_74 = arith.constant dense<0.000000e+00> : vector<8x128xf32>
    %89 = tpu.matmul %86, %88, %cst_74 {dimension_numbers = #tpu.dot_dimension_numbers<[1], [0], [0], [1], [0, 0, 1, 1], [], []>} : vector<8x128xbf16>, vector<128x128xbf16>, vector<8x128xf32> -> vector<8x128xf32>
    %90 = arith.addf %82, %89 : vector<8x128xf32>
    %c3_75 = arith.constant 3 : index
    %c0_76 = arith.constant 0 : index
    %c0_77 = arith.constant 0 : index
    %91 = vector.load %arg7[%c3_75, %c0_76, %c0_77] : memref<4x8x16xbf16, #tpu.memory_space<vmem>>, vector<1x8x16xbf16>
    %92 = vector.shape_cast %91 : vector<1x8x16xbf16> to vector<8x16xbf16>
    %cst_78 = arith.constant dense<0.000000e+00> : vector<8x128xf32>
    %93 = tpu.matmul %92, %67, %cst_78 {dimension_numbers = #tpu.dot_dimension_numbers<[1], [0], [0], [1], [0, 0, 1, 1], [], []>} : vector<8x16xbf16>, vector<16x128xbf16>, vector<8x128xf32> -> vector<8x128xf32>
    %94 = arith.truncf %93 : vector<8x128xf32> to vector<8x128xbf16>
    %c3_79 = arith.constant 3 : index
    %c0_80 = arith.constant 0 : index
    %c0_81 = arith.constant 0 : index
    %95 = vector.load %arg8[%c3_79, %c0_80, %c0_81] : memref<4x128x128xbf16, #tpu.memory_space<vmem>>, vector<1x128x128xbf16>
    %96 = vector.shape_cast %95 : vector<1x128x128xbf16> to vector<128x128xbf16>
    %cst_82 = arith.constant dense<0.000000e+00> : vector<8x128xf32>
    %97 = tpu.matmul %94, %96, %cst_82 {dimension_numbers = #tpu.dot_dimension_numbers<[1], [0], [0], [1], [0, 0, 1, 1], [], []>} : vector<8x128xbf16>, vector<128x128xbf16>, vector<8x128xf32> -> vector<8x128xf32>
    %98 = arith.addf %90, %97 : vector<8x128xf32>
    %cst_83 = arith.constant dense<0.000000e+00> : vector<128xf32>
    %99 = vector.multi_reduction <add>, %98, %cst_83 [0] : vector<8x128xf32> to vector<128xf32>
    %100 = vector.shape_cast %99 : vector<128xf32> to vector<1x128xf32>
    %101 = arith.mulf %98, %98 : vector<8x128xf32>
    %cst_84 = arith.constant dense<0.000000e+00> : vector<128xf32>
    %102 = vector.multi_reduction <add>, %101, %cst_84 [0] : vector<8x128xf32> to vector<128xf32>
    %103 = vector.shape_cast %102 : vector<128xf32> to vector<1x128xf32>
    %c0_85 = arith.constant 0 : index
    %c0_86 = arith.constant 0 : index
    %104 = vector.load %arg9[%c0_85, %c0_86] : memref<128x16xf32, #tpu.memory_space<vmem>>, vector<128x16xf32>
    %cst_87 = arith.constant dense<0.000000e+00> : vector<1x16xf32>
    %105 = tpu.matmul %100, %104, %cst_87 {dimension_numbers = #tpu.dot_dimension_numbers<[1], [0], [0], [1], [0, 0, 1, 1], [], []>} : vector<1x128xf32>, vector<128x16xf32>, vector<1x16xf32> -> vector<1x16xf32>
    %cst_88 = arith.constant 1.562500e-02 : f32
    %106 = vector.broadcast %cst_88 : f32 to vector<1x16xf32>
    %107 = arith.mulf %105, %106 : vector<1x16xf32>
    %c0_89 = arith.constant 0 : index
    %c0_90 = arith.constant 0 : index
    %108 = vector.load %arg9[%c0_89, %c0_90] : memref<128x16xf32, #tpu.memory_space<vmem>>, vector<128x16xf32>
    %cst_91 = arith.constant dense<0.000000e+00> : vector<1x16xf32>
    %109 = tpu.matmul %103, %108, %cst_91 {dimension_numbers = #tpu.dot_dimension_numbers<[1], [0], [0], [1], [0, 0, 1, 1], [], []>} : vector<1x128xf32>, vector<128x16xf32>, vector<1x16xf32> -> vector<1x16xf32>
    %cst_92 = arith.constant 1.562500e-02 : f32
    %110 = vector.broadcast %cst_92 : f32 to vector<1x16xf32>
    %111 = arith.mulf %109, %110 : vector<1x16xf32>
    %112 = arith.mulf %107, %107 : vector<1x16xf32>
    %113 = arith.subf %111, %112 : vector<1x16xf32>
    %cst_93 = arith.constant 0.000000e+00 : f32
    %114 = vector.broadcast %cst_93 : f32 to vector<1x16xf32>
    %115 = arith.maximumf %113, %114 : vector<1x16xf32>
    %cst_94 = arith.constant 9.99999974E-6 : f32
    %116 = vector.broadcast %cst_94 : f32 to vector<1x16xf32>
    %117 = arith.addf %115, %116 : vector<1x16xf32>
    %118 = math.rsqrt %117 : vector<1x16xf32>
    %c0_95 = arith.constant 0 : index
    %c0_96 = arith.constant 0 : index
    %119 = vector.load %arg10[%c0_95, %c0_96] : memref<16x128xf32, #tpu.memory_space<vmem>>, vector<16x128xf32>
    %cst_97 = arith.constant dense<0.000000e+00> : vector<1x128xf32>
    %120 = tpu.matmul %118, %119, %cst_97 {dimension_numbers = #tpu.dot_dimension_numbers<[1], [0], [0], [1], [0, 0, 1, 1], [], []>} : vector<1x16xf32>, vector<16x128xf32>, vector<1x128xf32> -> vector<1x128xf32>
    %c0_98 = arith.constant 0 : index
    %c0_99 = arith.constant 0 : index
    %121 = vector.load %arg11[%c0_98, %c0_99] : memref<1x128xf32, #tpu.memory_space<vmem>>, vector<1x128xf32>
    %122 = arith.mulf %107, %118 : vector<1x16xf32>
    %c0_100 = arith.constant 0 : index
    %c0_101 = arith.constant 0 : index
    %123 = vector.load %arg10[%c0_100, %c0_101] : memref<16x128xf32, #tpu.memory_space<vmem>>, vector<16x128xf32>
    %cst_102 = arith.constant dense<0.000000e+00> : vector<1x128xf32>
    %124 = tpu.matmul %122, %123, %cst_102 {dimension_numbers = #tpu.dot_dimension_numbers<[1], [0], [0], [1], [0, 0, 1, 1], [], []>} : vector<1x16xf32>, vector<16x128xf32>, vector<1x128xf32> -> vector<1x128xf32>
    %125 = arith.subf %121, %124 : vector<1x128xf32>
    %126 = vector.broadcast %120 : vector<1x128xf32> to vector<8x128xf32>
    %127 = arith.mulf %98, %126 : vector<8x128xf32>
    %128 = vector.broadcast %125 : vector<1x128xf32> to vector<8x128xf32>
    %129 = arith.addf %127, %128 : vector<8x128xf32>
    %cst_103 = arith.constant 0.00999999977 : f32
    %130 = vector.broadcast %cst_103 : f32 to vector<8x128xf32>
    %131 = arith.mulf %130, %129 : vector<8x128xf32>
    %132 = arith.maximumf %129, %131 : vector<8x128xf32>
    %133 = arith.truncf %132 : vector<8x128xf32> to vector<8x128xbf16>
    %c0_104 = arith.constant 0 : index
    %c0_105 = arith.constant 0 : index
    %c0_106 = arith.constant 0 : index
    %134 = vector.load %arg12[%c0_104, %c0_105, %c0_106] : memref<4x4x8xbf16, #tpu.memory_space<vmem>>, vector<1x4x8xbf16>
    %135 = vector.shape_cast %134 : vector<1x4x8xbf16> to vector<4x8xbf16>
    %cst_107 = arith.constant dense<0.000000e+00> : vector<4x128xf32>
    %136 = tpu.matmul %135, %133, %cst_107 {dimension_numbers = #tpu.dot_dimension_numbers<[1], [0], [0], [1], [0, 0, 1, 1], [], []>} : vector<4x8xbf16>, vector<8x128xbf16>, vector<4x128xf32> -> vector<4x128xf32>
    %137 = arith.truncf %136 : vector<4x128xf32> to vector<4x128xbf16>
    %c0_108 = arith.constant 0 : index
    %c0_109 = arith.constant 0 : index
    %c0_110 = arith.constant 0 : index
    %138 = vector.load %arg13[%c0_108, %c0_109, %c0_110] : memref<4x128x128xbf16, #tpu.memory_space<vmem>>, vector<1x128x128xbf16>
    %139 = vector.shape_cast %138 : vector<1x128x128xbf16> to vector<128x128xbf16>
    %cst_111 = arith.constant dense<0.000000e+00> : vector<4x128xf32>
    %140 = tpu.matmul %137, %139, %cst_111 {dimension_numbers = #tpu.dot_dimension_numbers<[1], [0], [0], [1], [0, 0, 1, 1], [], []>} : vector<4x128xbf16>, vector<128x128xbf16>, vector<4x128xf32> -> vector<4x128xf32>
    %c1_112 = arith.constant 1 : index
    %c0_113 = arith.constant 0 : index
    %c0_114 = arith.constant 0 : index
    %141 = vector.load %arg12[%c1_112, %c0_113, %c0_114] : memref<4x4x8xbf16, #tpu.memory_space<vmem>>, vector<1x4x8xbf16>
    %142 = vector.shape_cast %141 : vector<1x4x8xbf16> to vector<4x8xbf16>
    %cst_115 = arith.constant dense<0.000000e+00> : vector<4x128xf32>
    %143 = tpu.matmul %142, %133, %cst_115 {dimension_numbers = #tpu.dot_dimension_numbers<[1], [0], [0], [1], [0, 0, 1, 1], [], []>} : vector<4x8xbf16>, vector<8x128xbf16>, vector<4x128xf32> -> vector<4x128xf32>
    %144 = arith.truncf %143 : vector<4x128xf32> to vector<4x128xbf16>
    %c1_116 = arith.constant 1 : index
    %c0_117 = arith.constant 0 : index
    %c0_118 = arith.constant 0 : index
    %145 = vector.load %arg13[%c1_116, %c0_117, %c0_118] : memref<4x128x128xbf16, #tpu.memory_space<vmem>>, vector<1x128x128xbf16>
    %146 = vector.shape_cast %145 : vector<1x128x128xbf16> to vector<128x128xbf16>
    %cst_119 = arith.constant dense<0.000000e+00> : vector<4x128xf32>
    %147 = tpu.matmul %144, %146, %cst_119 {dimension_numbers = #tpu.dot_dimension_numbers<[1], [0], [0], [1], [0, 0, 1, 1], [], []>} : vector<4x128xbf16>, vector<128x128xbf16>, vector<4x128xf32> -> vector<4x128xf32>
    %148 = arith.addf %140, %147 : vector<4x128xf32>
    %c2_120 = arith.constant 2 : index
    %c0_121 = arith.constant 0 : index
    %c0_122 = arith.constant 0 : index
    %149 = vector.load %arg12[%c2_120, %c0_121, %c0_122] : memref<4x4x8xbf16, #tpu.memory_space<vmem>>, vector<1x4x8xbf16>
    %150 = vector.shape_cast %149 : vector<1x4x8xbf16> to vector<4x8xbf16>
    %cst_123 = arith.constant dense<0.000000e+00> : vector<4x128xf32>
    %151 = tpu.matmul %150, %133, %cst_123 {dimension_numbers = #tpu.dot_dimension_numbers<[1], [0], [0], [1], [0, 0, 1, 1], [], []>} : vector<4x8xbf16>, vector<8x128xbf16>, vector<4x128xf32> -> vector<4x128xf32>
    %152 = arith.truncf %151 : vector<4x128xf32> to vector<4x128xbf16>
    %c2_124 = arith.constant 2 : index
    %c0_125 = arith.constant 0 : index
    %c0_126 = arith.constant 0 : index
    %153 = vector.load %arg13[%c2_124, %c0_125, %c0_126] : memref<4x128x128xbf16, #tpu.memory_space<vmem>>, vector<1x128x128xbf16>
    %154 = vector.shape_cast %153 : vector<1x128x128xbf16> to vector<128x128xbf16>
    %cst_127 = arith.constant dense<0.000000e+00> : vector<4x128xf32>
    %155 = tpu.matmul %152, %154, %cst_127 {dimension_numbers = #tpu.dot_dimension_numbers<[1], [0], [0], [1], [0, 0, 1, 1], [], []>} : vector<4x128xbf16>, vector<128x128xbf16>, vector<4x128xf32> -> vector<4x128xf32>
    %156 = arith.addf %148, %155 : vector<4x128xf32>
    %c3_128 = arith.constant 3 : index
    %c0_129 = arith.constant 0 : index
    %c0_130 = arith.constant 0 : index
    %157 = vector.load %arg12[%c3_128, %c0_129, %c0_130] : memref<4x4x8xbf16, #tpu.memory_space<vmem>>, vector<1x4x8xbf16>
    %158 = vector.shape_cast %157 : vector<1x4x8xbf16> to vector<4x8xbf16>
    %cst_131 = arith.constant dense<0.000000e+00> : vector<4x128xf32>
    %159 = tpu.matmul %158, %133, %cst_131 {dimension_numbers = #tpu.dot_dimension_numbers<[1], [0], [0], [1], [0, 0, 1, 1], [], []>} : vector<4x8xbf16>, vector<8x128xbf16>, vector<4x128xf32> -> vector<4x128xf32>
    %160 = arith.truncf %159 : vector<4x128xf32> to vector<4x128xbf16>
    %c3_132 = arith.constant 3 : index
    %c0_133 = arith.constant 0 : index
    %c0_134 = arith.constant 0 : index
    %161 = vector.load %arg13[%c3_132, %c0_133, %c0_134] : memref<4x128x128xbf16, #tpu.memory_space<vmem>>, vector<1x128x128xbf16>
    %162 = vector.shape_cast %161 : vector<1x128x128xbf16> to vector<128x128xbf16>
    %cst_135 = arith.constant dense<0.000000e+00> : vector<4x128xf32>
    %163 = tpu.matmul %160, %162, %cst_135 {dimension_numbers = #tpu.dot_dimension_numbers<[1], [0], [0], [1], [0, 0, 1, 1], [], []>} : vector<4x128xbf16>, vector<128x128xbf16>, vector<4x128xf32> -> vector<4x128xf32>
    %164 = arith.addf %156, %163 : vector<4x128xf32>
    %cst_136 = arith.constant dense<0.000000e+00> : vector<128xf32>
    %165 = vector.multi_reduction <add>, %164, %cst_136 [0] : vector<4x128xf32> to vector<128xf32>
    %166 = vector.shape_cast %165 : vector<128xf32> to vector<1x128xf32>
    %167 = arith.mulf %164, %164 : vector<4x128xf32>
    %cst_137 = arith.constant dense<0.000000e+00> : vector<128xf32>
    %168 = vector.multi_reduction <add>, %167, %cst_137 [0] : vector<4x128xf32> to vector<128xf32>
    %169 = vector.shape_cast %168 : vector<128xf32> to vector<1x128xf32>
    %c0_138 = arith.constant 0 : index
    %c0_139 = arith.constant 0 : index
    %170 = vector.load %arg14[%c0_138, %c0_139] : memref<128x32xf32, #tpu.memory_space<vmem>>, vector<128x32xf32>
    %cst_140 = arith.constant dense<0.000000e+00> : vector<1x32xf32>
    %171 = tpu.matmul %166, %170, %cst_140 {dimension_numbers = #tpu.dot_dimension_numbers<[1], [0], [0], [1], [0, 0, 1, 1], [], []>} : vector<1x128xf32>, vector<128x32xf32>, vector<1x32xf32> -> vector<1x32xf32>
    %cst_141 = arith.constant 6.250000e-02 : f32
    %172 = vector.broadcast %cst_141 : f32 to vector<1x32xf32>
    %173 = arith.mulf %171, %172 : vector<1x32xf32>
    %c0_142 = arith.constant 0 : index
    %c0_143 = arith.constant 0 : index
    %174 = vector.load %arg14[%c0_142, %c0_143] : memref<128x32xf32, #tpu.memory_space<vmem>>, vector<128x32xf32>
    %cst_144 = arith.constant dense<0.000000e+00> : vector<1x32xf32>
    %175 = tpu.matmul %169, %174, %cst_144 {dimension_numbers = #tpu.dot_dimension_numbers<[1], [0], [0], [1], [0, 0, 1, 1], [], []>} : vector<1x128xf32>, vector<128x32xf32>, vector<1x32xf32> -> vector<1x32xf32>
    %cst_145 = arith.constant 6.250000e-02 : f32
    %176 = vector.broadcast %cst_145 : f32 to vector<1x32xf32>
    %177 = arith.mulf %175, %176 : vector<1x32xf32>
    %178 = arith.mulf %173, %173 : vector<1x32xf32>
    %179 = arith.subf %177, %178 : vector<1x32xf32>
    %cst_146 = arith.constant 0.000000e+00 : f32
    %180 = vector.broadcast %cst_146 : f32 to vector<1x32xf32>
    %181 = arith.maximumf %179, %180 : vector<1x32xf32>
    %cst_147 = arith.constant 9.99999974E-6 : f32
    %182 = vector.broadcast %cst_147 : f32 to vector<1x32xf32>
    %183 = arith.addf %181, %182 : vector<1x32xf32>
    %184 = math.rsqrt %183 : vector<1x32xf32>
    %c0_148 = arith.constant 0 : index
    %c0_149 = arith.constant 0 : index
    %185 = vector.load %arg15[%c0_148, %c0_149] : memref<32x128xf32, #tpu.memory_space<vmem>>, vector<32x128xf32>
    %cst_150 = arith.constant dense<0.000000e+00> : vector<1x128xf32>
    %186 = tpu.matmul %184, %185, %cst_150 {dimension_numbers = #tpu.dot_dimension_numbers<[1], [0], [0], [1], [0, 0, 1, 1], [], []>} : vector<1x32xf32>, vector<32x128xf32>, vector<1x128xf32> -> vector<1x128xf32>
    %c0_151 = arith.constant 0 : index
    %c0_152 = arith.constant 0 : index
    %187 = vector.load %arg16[%c0_151, %c0_152] : memref<1x128xf32, #tpu.memory_space<vmem>>, vector<1x128xf32>
    %188 = arith.mulf %173, %184 : vector<1x32xf32>
    %c0_153 = arith.constant 0 : index
    %c0_154 = arith.constant 0 : index
    %189 = vector.load %arg15[%c0_153, %c0_154] : memref<32x128xf32, #tpu.memory_space<vmem>>, vector<32x128xf32>
    %cst_155 = arith.constant dense<0.000000e+00> : vector<1x128xf32>
    %190 = tpu.matmul %188, %189, %cst_155 {dimension_numbers = #tpu.dot_dimension_numbers<[1], [0], [0], [1], [0, 0, 1, 1], [], []>} : vector<1x32xf32>, vector<32x128xf32>, vector<1x128xf32> -> vector<1x128xf32>
    %191 = arith.subf %187, %190 : vector<1x128xf32>
    %192 = vector.broadcast %186 : vector<1x128xf32> to vector<4x128xf32>
    %193 = arith.mulf %164, %192 : vector<4x128xf32>
    %194 = vector.broadcast %191 : vector<1x128xf32> to vector<4x128xf32>
    %195 = arith.addf %193, %194 : vector<4x128xf32>
    %cst_156 = arith.constant 0.00999999977 : f32
    %196 = vector.broadcast %cst_156 : f32 to vector<4x128xf32>
    %197 = arith.mulf %196, %195 : vector<4x128xf32>
    %198 = arith.maximumf %195, %197 : vector<4x128xf32>
    %199 = arith.truncf %198 : vector<4x128xf32> to vector<4x128xbf16>
    %c0_157 = arith.constant 0 : index
    %c0_158 = arith.constant 0 : index
    %c0_159 = arith.constant 0 : index
    %200 = vector.load %arg17[%c0_157, %c0_158, %c0_159] : memref<4x2x4xbf16, #tpu.memory_space<vmem>>, vector<1x2x4xbf16>
    %201 = vector.shape_cast %200 : vector<1x2x4xbf16> to vector<2x4xbf16>
    %cst_160 = arith.constant dense<0.000000e+00> : vector<2x128xf32>
    %202 = tpu.matmul %201, %199, %cst_160 {dimension_numbers = #tpu.dot_dimension_numbers<[1], [0], [0], [1], [0, 0, 1, 1], [], []>} : vector<2x4xbf16>, vector<4x128xbf16>, vector<2x128xf32> -> vector<2x128xf32>
    %203 = arith.truncf %202 : vector<2x128xf32> to vector<2x128xbf16>
    %c0_161 = arith.constant 0 : index
    %c0_162 = arith.constant 0 : index
    %c0_163 = arith.constant 0 : index
    %204 = vector.load %arg18[%c0_161, %c0_162, %c0_163] : memref<4x128x128xbf16, #tpu.memory_space<vmem>>, vector<1x128x128xbf16>
    %205 = vector.shape_cast %204 : vector<1x128x128xbf16> to vector<128x128xbf16>
    %cst_164 = arith.constant dense<0.000000e+00> : vector<2x128xf32>
    %206 = tpu.matmul %203, %205, %cst_164 {dimension_numbers = #tpu.dot_dimension_numbers<[1], [0], [0], [1], [0, 0, 1, 1], [], []>} : vector<2x128xbf16>, vector<128x128xbf16>, vector<2x128xf32> -> vector<2x128xf32>
    %c1_165 = arith.constant 1 : index
    %c0_166 = arith.constant 0 : index
    %c0_167 = arith.constant 0 : index
    %207 = vector.load %arg17[%c1_165, %c0_166, %c0_167] : memref<4x2x4xbf16, #tpu.memory_space<vmem>>, vector<1x2x4xbf16>
    %208 = vector.shape_cast %207 : vector<1x2x4xbf16> to vector<2x4xbf16>
    %cst_168 = arith.constant dense<0.000000e+00> : vector<2x128xf32>
    %209 = tpu.matmul %208, %199, %cst_168 {dimension_numbers = #tpu.dot_dimension_numbers<[1], [0], [0], [1], [0, 0, 1, 1], [], []>} : vector<2x4xbf16>, vector<4x128xbf16>, vector<2x128xf32> -> vector<2x128xf32>
    %210 = arith.truncf %209 : vector<2x128xf32> to vector<2x128xbf16>
    %c1_169 = arith.constant 1 : index
    %c0_170 = arith.constant 0 : index
    %c0_171 = arith.constant 0 : index
    %211 = vector.load %arg18[%c1_169, %c0_170, %c0_171] : memref<4x128x128xbf16, #tpu.memory_space<vmem>>, vector<1x128x128xbf16>
    %212 = vector.shape_cast %211 : vector<1x128x128xbf16> to vector<128x128xbf16>
    %cst_172 = arith.constant dense<0.000000e+00> : vector<2x128xf32>
    %213 = tpu.matmul %210, %212, %cst_172 {dimension_numbers = #tpu.dot_dimension_numbers<[1], [0], [0], [1], [0, 0, 1, 1], [], []>} : vector<2x128xbf16>, vector<128x128xbf16>, vector<2x128xf32> -> vector<2x128xf32>
    %214 = arith.addf %206, %213 : vector<2x128xf32>
    %c2_173 = arith.constant 2 : index
    %c0_174 = arith.constant 0 : index
    %c0_175 = arith.constant 0 : index
    %215 = vector.load %arg17[%c2_173, %c0_174, %c0_175] : memref<4x2x4xbf16, #tpu.memory_space<vmem>>, vector<1x2x4xbf16>
    %216 = vector.shape_cast %215 : vector<1x2x4xbf16> to vector<2x4xbf16>
    %cst_176 = arith.constant dense<0.000000e+00> : vector<2x128xf32>
    %217 = tpu.matmul %216, %199, %cst_176 {dimension_numbers = #tpu.dot_dimension_numbers<[1], [0], [0], [1], [0, 0, 1, 1], [], []>} : vector<2x4xbf16>, vector<4x128xbf16>, vector<2x128xf32> -> vector<2x128xf32>
    %218 = arith.truncf %217 : vector<2x128xf32> to vector<2x128xbf16>
    %c2_177 = arith.constant 2 : index
    %c0_178 = arith.constant 0 : index
    %c0_179 = arith.constant 0 : index
    %219 = vector.load %arg18[%c2_177, %c0_178, %c0_179] : memref<4x128x128xbf16, #tpu.memory_space<vmem>>, vector<1x128x128xbf16>
    %220 = vector.shape_cast %219 : vector<1x128x128xbf16> to vector<128x128xbf16>
    %cst_180 = arith.constant dense<0.000000e+00> : vector<2x128xf32>
    %221 = tpu.matmul %218, %220, %cst_180 {dimension_numbers = #tpu.dot_dimension_numbers<[1], [0], [0], [1], [0, 0, 1, 1], [], []>} : vector<2x128xbf16>, vector<128x128xbf16>, vector<2x128xf32> -> vector<2x128xf32>
    %222 = arith.addf %214, %221 : vector<2x128xf32>
    %c3_181 = arith.constant 3 : index
    %c0_182 = arith.constant 0 : index
    %c0_183 = arith.constant 0 : index
    %223 = vector.load %arg17[%c3_181, %c0_182, %c0_183] : memref<4x2x4xbf16, #tpu.memory_space<vmem>>, vector<1x2x4xbf16>
    %224 = vector.shape_cast %223 : vector<1x2x4xbf16> to vector<2x4xbf16>
    %cst_184 = arith.constant dense<0.000000e+00> : vector<2x128xf32>
    %225 = tpu.matmul %224, %199, %cst_184 {dimension_numbers = #tpu.dot_dimension_numbers<[1], [0], [0], [1], [0, 0, 1, 1], [], []>} : vector<2x4xbf16>, vector<4x128xbf16>, vector<2x128xf32> -> vector<2x128xf32>
    %226 = arith.truncf %225 : vector<2x128xf32> to vector<2x128xbf16>
    %c3_185 = arith.constant 3 : index
    %c0_186 = arith.constant 0 : index
    %c0_187 = arith.constant 0 : index
    %227 = vector.load %arg18[%c3_185, %c0_186, %c0_187] : memref<4x128x128xbf16, #tpu.memory_space<vmem>>, vector<1x128x128xbf16>
    %228 = vector.shape_cast %227 : vector<1x128x128xbf16> to vector<128x128xbf16>
    %cst_188 = arith.constant dense<0.000000e+00> : vector<2x128xf32>
    %229 = tpu.matmul %226, %228, %cst_188 {dimension_numbers = #tpu.dot_dimension_numbers<[1], [0], [0], [1], [0, 0, 1, 1], [], []>} : vector<2x128xbf16>, vector<128x128xbf16>, vector<2x128xf32> -> vector<2x128xf32>
    %230 = arith.addf %222, %229 : vector<2x128xf32>
    %cst_189 = arith.constant dense<0.000000e+00> : vector<128xf32>
    %231 = vector.multi_reduction <add>, %230, %cst_189 [0] : vector<2x128xf32> to vector<128xf32>
    %232 = vector.shape_cast %231 : vector<128xf32> to vector<1x128xf32>
    %233 = arith.mulf %230, %230 : vector<2x128xf32>
    %cst_190 = arith.constant dense<0.000000e+00> : vector<128xf32>
    %234 = vector.multi_reduction <add>, %233, %cst_190 [0] : vector<2x128xf32> to vector<128xf32>
    %235 = vector.shape_cast %234 : vector<128xf32> to vector<1x128xf32>
    %c0_191 = arith.constant 0 : index
    %c0_192 = arith.constant 0 : index
    %236 = vector.load %arg19[%c0_191, %c0_192] : memref<128x64xf32, #tpu.memory_space<vmem>>, vector<128x64xf32>
    %cst_193 = arith.constant dense<0.000000e+00> : vector<1x64xf32>
    %237 = tpu.matmul %232, %236, %cst_193 {dimension_numbers = #tpu.dot_dimension_numbers<[1], [0], [0], [1], [0, 0, 1, 1], [], []>} : vector<1x128xf32>, vector<128x64xf32>, vector<1x64xf32> -> vector<1x64xf32>
    %cst_194 = arith.constant 2.500000e-01 : f32
    %238 = vector.broadcast %cst_194 : f32 to vector<1x64xf32>
    %239 = arith.mulf %237, %238 : vector<1x64xf32>
    %c0_195 = arith.constant 0 : index
    %c0_196 = arith.constant 0 : index
    %240 = vector.load %arg19[%c0_195, %c0_196] : memref<128x64xf32, #tpu.memory_space<vmem>>, vector<128x64xf32>
    %cst_197 = arith.constant dense<0.000000e+00> : vector<1x64xf32>
    %241 = tpu.matmul %235, %240, %cst_197 {dimension_numbers = #tpu.dot_dimension_numbers<[1], [0], [0], [1], [0, 0, 1, 1], [], []>} : vector<1x128xf32>, vector<128x64xf32>, vector<1x64xf32> -> vector<1x64xf32>
    %cst_198 = arith.constant 2.500000e-01 : f32
    %242 = vector.broadcast %cst_198 : f32 to vector<1x64xf32>
    %243 = arith.mulf %241, %242 : vector<1x64xf32>
    %244 = arith.mulf %239, %239 : vector<1x64xf32>
    %245 = arith.subf %243, %244 : vector<1x64xf32>
    %cst_199 = arith.constant 0.000000e+00 : f32
    %246 = vector.broadcast %cst_199 : f32 to vector<1x64xf32>
    %247 = arith.maximumf %245, %246 : vector<1x64xf32>
    %cst_200 = arith.constant 9.99999974E-6 : f32
    %248 = vector.broadcast %cst_200 : f32 to vector<1x64xf32>
    %249 = arith.addf %247, %248 : vector<1x64xf32>
    %250 = math.rsqrt %249 : vector<1x64xf32>
    %c0_201 = arith.constant 0 : index
    %c0_202 = arith.constant 0 : index
    %251 = vector.load %arg20[%c0_201, %c0_202] : memref<64x128xf32, #tpu.memory_space<vmem>>, vector<64x128xf32>
    %cst_203 = arith.constant dense<0.000000e+00> : vector<1x128xf32>
    %252 = tpu.matmul %250, %251, %cst_203 {dimension_numbers = #tpu.dot_dimension_numbers<[1], [0], [0], [1], [0, 0, 1, 1], [], []>} : vector<1x64xf32>, vector<64x128xf32>, vector<1x128xf32> -> vector<1x128xf32>
    %c0_204 = arith.constant 0 : index
    %c0_205 = arith.constant 0 : index
    %253 = vector.load %arg21[%c0_204, %c0_205] : memref<1x128xf32, #tpu.memory_space<vmem>>, vector<1x128xf32>
    %254 = arith.mulf %239, %250 : vector<1x64xf32>
    %c0_206 = arith.constant 0 : index
    %c0_207 = arith.constant 0 : index
    %255 = vector.load %arg20[%c0_206, %c0_207] : memref<64x128xf32, #tpu.memory_space<vmem>>, vector<64x128xf32>
    %cst_208 = arith.constant dense<0.000000e+00> : vector<1x128xf32>
    %256 = tpu.matmul %254, %255, %cst_208 {dimension_numbers = #tpu.dot_dimension_numbers<[1], [0], [0], [1], [0, 0, 1, 1], [], []>} : vector<1x64xf32>, vector<64x128xf32>, vector<1x128xf32> -> vector<1x128xf32>
    %257 = arith.subf %253, %256 : vector<1x128xf32>
    %258 = vector.broadcast %252 : vector<1x128xf32> to vector<2x128xf32>
    %259 = arith.mulf %230, %258 : vector<2x128xf32>
    %260 = vector.broadcast %257 : vector<1x128xf32> to vector<2x128xf32>
    %261 = arith.addf %259, %260 : vector<2x128xf32>
    %cst_209 = arith.constant 0.00999999977 : f32
    %262 = vector.broadcast %cst_209 : f32 to vector<2x128xf32>
    %263 = arith.mulf %262, %261 : vector<2x128xf32>
    %264 = arith.maximumf %261, %263 : vector<2x128xf32>
    %c0_210 = arith.constant 0 : index
    %c0_211 = arith.constant 0 : index
    %c0_212 = arith.constant 0 : index
    %265 = vector.load %arg22[%c0_210, %c0_211, %c0_212] : memref<1x2x128xf32, #tpu.memory_space<vmem>>, vector<1x2x128xf32>
    %266 = vector.shape_cast %265 : vector<1x2x128xf32> to vector<2x128xf32>
    %267 = vector.shape_cast %264 : vector<2x128xf32> to vector<1x2x128xf32>
    tpu.vector_store %arg22[%c0_210, %c0_211, %c0_212], %267 {strides = array<i32>} : memref<1x2x128xf32, #tpu.memory_space<vmem>>, vector<1x2x128xf32>,
    return
  }
  func.func @transform_0(%arg0: i32) -> (i32, i32, i32) {
    %c0_i32 = arith.constant 0 : i32
    %c0_i32_0 = arith.constant 0 : i32
    %c0_i32_1 = arith.constant 0 : i32
    return %arg0, %c0_i32, %c0_i32_0 : i32, i32, i32
  }
  func.func @transform_1(%arg0: i32) -> (i32, i32, i32) {
    %c0_i32 = arith.constant 0 : i32
    %c0_i32_0 = arith.constant 0 : i32
    %c0_i32_1 = arith.constant 0 : i32
    %c0_i32_2 = arith.constant 0 : i32
    return %c0_i32, %c0_i32_0, %c0_i32_1 : i32, i32, i32
  }
  func.func @transform_2(%arg0: i32) -> (i32, i32, i32) {
    %c0_i32 = arith.constant 0 : i32
    %c0_i32_0 = arith.constant 0 : i32
    %c0_i32_1 = arith.constant 0 : i32
    %c0_i32_2 = arith.constant 0 : i32
    return %c0_i32, %c0_i32_0, %c0_i32_1 : i32, i32, i32
  }
  func.func @transform_3(%arg0: i32) -> (i32, i32) {
    %c0_i32 = arith.constant 0 : i32
    %c0_i32_0 = arith.constant 0 : i32
    %c0_i32_1 = arith.constant 0 : i32
    return %c0_i32, %c0_i32_0 : i32, i32
  }
  func.func @transform_4(%arg0: i32) -> (i32, i32) {
    %c0_i32 = arith.constant 0 : i32
    %c0_i32_0 = arith.constant 0 : i32
    %c0_i32_1 = arith.constant 0 : i32
    return %c0_i32, %c0_i32_0 : i32, i32
  }
  func.func @transform_5(%arg0: i32) -> (i32, i32) {
    %c0_i32 = arith.constant 0 : i32
    %c0_i32_0 = arith.constant 0 : i32
    %c0_i32_1 = arith.constant 0 : i32
    return %c0_i32, %c0_i32_0 : i32, i32
  }
  func.func @transform_6(%arg0: i32) -> (i32, i32, i32) {
    %c0_i32 = arith.constant 0 : i32
    %c0_i32_0 = arith.constant 0 : i32
    %c0_i32_1 = arith.constant 0 : i32
    %c0_i32_2 = arith.constant 0 : i32
    return %c0_i32, %c0_i32_0, %c0_i32_1 : i32, i32, i32
  }
  func.func @transform_7(%arg0: i32) -> (i32, i32, i32) {
    %c0_i32 = arith.constant 0 : i32
    %c0_i32_0 = arith.constant 0 : i32
    %c0_i32_1 = arith.constant 0 : i32
    %c0_i32_2 = arith.constant 0 : i32
    return %c0_i32, %c0_i32_0, %c0_i32_1 : i32, i32, i32
  }
  func.func @transform_8(%arg0: i32) -> (i32, i32) {
    %c0_i32 = arith.constant 0 : i32
    %c0_i32_0 = arith.constant 0 : i32
    %c0_i32_1 = arith.constant 0 : i32
    return %c0_i32, %c0_i32_0 : i32, i32
  }
  func.func @transform_9(%arg0: i32) -> (i32, i32) {
    %c0_i32 = arith.constant 0 : i32
    %c0_i32_0 = arith.constant 0 : i32
    %c0_i32_1 = arith.constant 0 : i32
    return %c0_i32, %c0_i32_0 : i32, i32
  }
  func.func @transform_10(%arg0: i32) -> (i32, i32) {
    %c0_i32 = arith.constant 0 : i32
    %c0_i32_0 = arith.constant 0 : i32
    %c0_i32_1 = arith.constant 0 : i32
    return %c0_i32, %c0_i32_0 : i32, i32
  }
  func.func @transform_11(%arg0: i32) -> (i32, i32, i32) {
    %c0_i32 = arith.constant 0 : i32
    %c0_i32_0 = arith.constant 0 : i32
    %c0_i32_1 = arith.constant 0 : i32
    %c0_i32_2 = arith.constant 0 : i32
    return %c0_i32, %c0_i32_0, %c0_i32_1 : i32, i32, i32
  }
  func.func @transform_12(%arg0: i32) -> (i32, i32, i32) {
    %c0_i32 = arith.constant 0 : i32
    %c0_i32_0 = arith.constant 0 : i32
    %c0_i32_1 = arith.constant 0 : i32
    %c0_i32_2 = arith.constant 0 : i32
    return %c0_i32, %c0_i32_0, %c0_i32_1 : i32, i32, i32
  }
  func.func @transform_13(%arg0: i32) -> (i32, i32) {
    %c0_i32 = arith.constant 0 : i32
    %c0_i32_0 = arith.constant 0 : i32
    %c0_i32_1 = arith.constant 0 : i32
    return %c0_i32, %c0_i32_0 : i32, i32
  }
  func.func @transform_14(%arg0: i32) -> (i32, i32) {
    %c0_i32 = arith.constant 0 : i32
    %c0_i32_0 = arith.constant 0 : i32
    %c0_i32_1 = arith.constant 0 : i32
    return %c0_i32, %c0_i32_0 : i32, i32
  }
  func.func @transform_15(%arg0: i32) -> (i32, i32) {
    %c0_i32 = arith.constant 0 : i32
    %c0_i32_0 = arith.constant 0 : i32
    %c0_i32_1 = arith.constant 0 : i32
    return %c0_i32, %c0_i32_0 : i32, i32
  }
  func.func @transform_16(%arg0: i32) -> (i32, i32, i32) {
    %c0_i32 = arith.constant 0 : i32
    %c0_i32_0 = arith.constant 0 : i32
    %c0_i32_1 = arith.constant 0 : i32
    %c0_i32_2 = arith.constant 0 : i32
    return %c0_i32, %c0_i32_0, %c0_i32_1 : i32, i32, i32
  }
  func.func @transform_17(%arg0: i32) -> (i32, i32, i32) {
    %c0_i32 = arith.constant 0 : i32
    %c0_i32_0 = arith.constant 0 : i32
    %c0_i32_1 = arith.constant 0 : i32
    %c0_i32_2 = arith.constant 0 : i32
    return %c0_i32, %c0_i32_0, %c0_i32_1 : i32, i32, i32
  }
  func.func @transform_18(%arg0: i32) -> (i32, i32) {
    %c0_i32 = arith.constant 0 : i32
    %c0_i32_0 = arith.constant 0 : i32
    %c0_i32_1 = arith.constant 0 : i32
    return %c0_i32, %c0_i32_0 : i32, i32
  }
  func.func @transform_19(%arg0: i32) -> (i32, i32) {
    %c0_i32 = arith.constant 0 : i32
    %c0_i32_0 = arith.constant 0 : i32
    %c0_i32_1 = arith.constant 0 : i32
    return %c0_i32, %c0_i32_0 : i32, i32
  }
  func.func @transform_20(%arg0: i32) -> (i32, i32) {
    %c0_i32 = arith.constant 0 : i32
    %c0_i32_0 = arith.constant 0 : i32
    %c0_i32_1 = arith.constant 0 : i32
    return %c0_i32, %c0_i32_0 : i32, i32
  }
  func.func @transform_21(%arg0: i32) -> (i32, i32, i32) {
    %c0_i32 = arith.constant 0 : i32
    %c0_i32_0 = arith.constant 0 : i32
    %c0_i32_1 = arith.constant 0 : i32
    return %arg0, %c0_i32, %c0_i32_0 : i32, i32, i32
  }
}

</mosaic_0001>

<bundles_post_ra>
// kernel: encoder_forward.1
= control target key start
LH: loop header
LB: loop body
LE: loop exit
PB: predicated region body
PF: predicated region fallthrough
CT: control target
= control target key end

     0   :  { %s4934_s0 = inlined_call_operand.vmem [shape: bf16[2,32,128], index: 0, kind: input, shape index: {}]   ;;  %s4935_s1 = inlined_call_operand.vmem [shape: bf16[4,16,32], index: 1, kind: input, shape index: {}]   ;;  %s4936_s2 = inlined_call_operand.vmem [shape: bf16[4,128,128], index: 2, kind: input, shape index: {}]   ;;  %s4937_s3 = inlined_call_operand.vmem [shape: f32[128,8], index: 3, kind: input, shape index: {}]   ;;  %s4938_s4 = inlined_call_operand.hbm [shape: f32[8,128], index: 4, kind: input, shape index: {}]   ;;  %s4939_s5 = inlined_call_operand.vmem [shape: f32[1,128], index: 5, kind: input, shape index: {}]   ;;  %s4940_s6 = inlined_call_operand.vmem [shape: bf16[4,8,16], index: 6, kind: input, shape index: {}]   ;;  %s4941_s7 = inlined_call_operand.vmem [shape: bf16[4,128,128], index: 7, kind: input, shape index: {}]   ;;  %s4942_s8 = inlined_call_operand.vmem [shape: f32[128,16], index: 8, kind: input, shape index: {}]   ;;  %s4943_s9 = inlined_call_operand.vmem [shape: f32[16,128], index: 9, kind: input, shape index: {}]   ;;  %s4944_s10 = inlined_call_operand.hbm [shape: f32[1,128], index: 10, kind: input, shape index: {}]   ;;  %s4945_s11 = inlined_call_operand.hbm [shape: bf16[4,4,8], index: 11, kind: input, shape index: {}]   ;;  %s4946_s12 = inlined_call_operand.vmem [shape: bf16[4,128,128], index: 12, kind: input, shape index: {}]   ;;  %s4947_s13 = inlined_call_operand.vmem [shape: f32[128,32], index: 13, kind: input, shape index: {}]   ;;  %s4948_s14 = inlined_call_operand.vmem [shape: f32[32,128], index: 14, kind: input, shape index: {}]   ;;  %s4949_s15 = inlined_call_operand.vmem [shape: f32[1,128], index: 15, kind: input, shape index: {}]   ;;  %s4950_s16 = inlined_call_operand.vmem [shape: bf16[4,2,4], index: 16, kind: input, shape index: {}]   ;;  %s4951_s17 = inlined_call_operand.vmem [shape: bf16[4,128,128], index: 17, kind: input, shape index: {}]   ;;  %s4952_s18 = inlined_call_operand.vmem [shape: f32[128,64], index: 18, kind: input, shape index: {}]   ;;  %s4953_s19 = inlined_call_operand.vmem [shape: f32[64,128], index: 19, kind: input, shape index: {}]   ;;  %s4954_s20 = inlined_call_operand.vmem [shape: f32[1,128], index: 20, kind: input, shape index: {}]   ;;  %s4955_s21 = inlined_call_operand.vmem [shape: f32[2,2,128], index: 21, kind: output, shape index: {}]  }
   0x1   :  { %4959 = sst [smem:[#allocation9_spill]] %s4934_s0 }
   0x2   :  { %4960 = sst [smem:[#allocation10_spill]] %s4935_s1 }
   0x3   :  { %4961 = sst [smem:[#allocation11_spill]] %s4936_s2 }
   0x4   :  { %4962 = sst [smem:[#allocation12_spill]] %s4937_s3 }
   0x5   :  { %4963 = sst [smem:[#allocation13_spill]] %s4938_s4 }
   0x6   :  { %4964 = sst [smem:[#allocation14_spill]] %s4939_s5 }
   0x7   :  { %4965 = sst [smem:[#allocation15_spill]] %s4944_s10 }
   0x8   :  { %26 = vsyncpa [#allocation3], 0 }
   0x9   :  { %27 = vsyncpa [#allocation5], 0  ;;  %s4184_s2 = smov 0  }
   0xa LB: > { %s4966_s10 = sld [smem:[#allocation15_spill]]  ;;  %s4193_s3 = sadd.s32 4294967295, %s4067_s2   ;;  %s4067_s2 = sphi %s4184_s2, %s33_s2  }
   0xb   : > { %p3001_p0 = scmp.ge.s32.totalorder %s4067_s2, 1  ;;  %p510_p1 = scmp.lt.s32.totalorder %s4067_s2, 3 }
   0xc   : > { %p3936_p2 = scmp.eq.s32.totalorder %s4193_s3, 0  ;;  %s4069_s29 = smov [#allocation4]  }
   0xd   : > { %p4198_p3 = pnand %p3001_p0, %p510_p1  ;;  %s560_s0 = sshll.u32 %s4069_s29, 4  ;;  %s561_s0 = int_to_ptr.vmem [resolvable:$true] %s560_s0 }
   0xe   : > { %s4968_s5 = sld [smem:[#allocation13_spill]]  ;;  %s569_s24 = sshll.u32 %s4945_s11, 4  ;;  %s570_s24 = int_to_ptr.hbm [resolvable:$true] %s569_s24 }
   0xf   : > { %p3926_p4 = pneg %p4198_p3  ;;  %s4070_s25 = smov [#allocation2]  }
  0x10   : > { %s558_s27 = sshll.u32 %s4966_s10, 4  ;;  %s533_s26 = sshll.u32 %s4070_s25, 4  ;;  %s559_s27 = int_to_ptr.hbm [resolvable:$true] %s558_s27  ;;  %s534_s26 = int_to_ptr.vmem [resolvable:$true] %s533_s26 }
  0x11   : > { %p3927_p5 = pnand %p3936_p2, %p3926_p4  ;;  %s4071_s29 = smov [#allocation6]  }
  0x12   : > { %s571_s10 = sshll.u32 %s4071_s29, 4  ;;  %s4072_s4 = smov 32   ;;  %s572_s10 = int_to_ptr.vmem [resolvable:$true] %s571_s10 }
  0x13   : > { %3932 = dma.hbm_to_vmem [thread:$0]  (!%p3927_p5), %s559_s27, 16, %s561_s0, [#allocation5]  }
  0x14   : > { %s531_s22 = sshll.u32 %s4968_s5, 4  ;;  %s4073_s30 = smov 2   ;;  %s532_s22 = int_to_ptr.hbm [resolvable:$true] %s531_s22 }
  0x15   : > { %3929 = dma.hbm_to_vmem [thread:$0]  (!%p3927_p5), %s532_s22, 128, %s534_s26, [#allocation3]  }
  0x16   : > { %3935 = dma.hbm_to_vmem [thread:$0]  (!%p3927_p5), %s570_s24, 128, %s572_s10, [#allocation5], %s4072_s4, %s4072_s4, %s4073_s30  }
  0x17   : > { %622 = sbr.rel (%p4198_p3) target bundleno = 2530 (0x9e2), region = 104 }
  0x1c   : > { %4058 = dma.done.wait (%p3936_p2), [#allocation3], 128  }
  0x1d   : > { %4060 = vsyncadd (%p3936_p2), [#allocation3], 4294967168 }
  0x1e   : > { %4062 = dma.done.wait (%p3936_p2), [#allocation5], 144  }
  0x1f   : > { %4064 = vsyncadd (%p3936_p2), [#allocation5], 4294967152  ;;  %p692_p6 = scmp.lt.s32.totalorder %s4193_s3, 1  ;;  %s4969_s0 = sld [smem:[#allocation9_spill]]  ;;  %vm725_vm0 = vcmask 261120   ;;  %vm1230_vm3 = vcmask 64512  }
  0x20   : > { %s4970_s1 = sld [smem:[#allocation10_spill]]  ;;  %vm1294_vm5 = vcmask 130048   ;;  %vm1831_vm9 = vcmask 1043456   ;;  %vm2373_vm13 = vcmask 1041408   ;;  %vm2369_vm14 = vcmask 31744  }
  0x21   : > { %s4975_s3 = smov (!%p692_p6, %s4193_s3), 1  ;;  %s4971_s4 = sld [smem:[#allocation11_spill]] }
  0x22   : > { %s3779_s10 = sshll.u32 %s4975_s3, 4  ;;  %s4972_s24 = sld [smem:[#allocation12_spill]] }
  0x23   : > { %s4973_s23 = sld [smem:[#allocation14_spill]]  ;;  %s3012_s28 = sshll.u32 %s4975_s3, 1 }
  0x24   : > { %s700_s22 = scalar_lea.vmem %s4955_s21, %s3012_s28 }
  0x25   : > { %s696_s5 = scalar_lea.vmem %s4969_s0, %s3779_s10 }
  0x26   : > { %v3781_v0 = vld [vmem:[%s696_s5 + $0x8] sm:$0xff]  ;;  %v3780_v1 = vld [vmem:[%s696_s5] sm:$0xff]  ;;  %v3800_v13 = vld [vmem:[%s4970_s1 + $0x10] sm:$0xff] }
  0x27   : > { %735 = vmatpush.bf16.msra.mxu0 %v3781_v0  ;;  %777 = vmatpush.bf16.msra.mxu1 %v3781_v0  ;;  %v3782_v2 = vld [vmem:[%s4970_s1] sm:$0xff]  ;;  %v3791_v3 = vld [vmem:[%s4970_s1 + $0x8] sm:$0xff]  ;;  %v3799_v4 = vld [vmem:[%s4971_s4 + $0x78] sm:$0xff] }
  0x28   : > { %v3790_v5 = vld [vmem:[%s4971_s4 + $0x38] sm:$0xff]  ;;  %851 = vmatpush.bf16.msra.mxu2 %v3799_v4  ;;  %v3798_v6 = vld [vmem:[%s4971_s4 + $0x70] sm:$0xff]  ;;  %v3797_v9 = vld [vmem:[%s4971_s4 + $0x68] sm:$0xff] }
  0x29   : > { %913 = vmatpush.bf16.msra.mxu3 %v3790_v5  ;;  %v3789_v7 = vld [vmem:[%s4971_s4 + $0x30] sm:$0xff]  ;;  %v3808_v8 = vld [vmem:[%s4971_s4 + $0xb8] sm:$0xff]  ;;  %v3788_v10 = vld [vmem:[%s4971_s4 + $0x28] sm:$0xff] }
  0x2a   : > { %v3796_v11 = vld [vmem:[%s4971_s4 + $0x60] sm:$0xff]  ;;  %v3795_v14 = vld [vmem:[%s4971_s4 + $0x58] sm:$0xff]  ;;  %v3794_v17 = vld [vmem:[%s4971_s4 + $0x50] sm:$0xff] }
  0x2b   : > { %736 = vmatpush.bf16.msra.mxu0 %v3780_v1  ;;  %778 = vmatpush.bf16.msra.mxu1 %v3780_v1  ;;  %v3787_v12 = vld [vmem:[%s4971_s4 + $0x20] sm:$0xff]  ;;  %v3786_v15 = vld [vmem:[%s4971_s4 + $0x18] sm:$0xff]  ;;  %v3785_v18 = vld [vmem:[%s4971_s4 + $0x10] sm:$0xff] }
  0x2c   : > { %852 = vmatpush.bf16.msra.mxu2 %v3798_v6  ;;  %v3809_v16 = vld [vmem:[%s4970_s1 + $0x18] sm:$0xff]  ;;  %v3807_v19 = vld [vmem:[%s4971_s4 + $0xb0] sm:$0xff]  ;;  %v3793_v20 = vld [vmem:[%s4971_s4 + $0x48] sm:$0xff] }
  0x2d   : > { %914 = vmatpush.bf16.msra.mxu3 %v3789_v7  ;;  %v3784_v21 = vld [vmem:[%s4971_s4 + $0x8] sm:$0xff]  ;;  %v3792_v23 = vld [vmem:[%s4971_s4 + $0x40] sm:$0xff]  ;;  %v3804_v26 = vld [vmem:[%s4971_s4 + $0x98] sm:$0xff] }
  0x2e   : > { %3025 = vmatmul.msk.bf16.vlgmr.msra.gmra.mxu0 %vm725_vm0, %v3782_v2  ;;  %3032 = vmatmul.msk.bf16.vlgmr.msra.gmra.mxu1 %vm725_vm0, %v3791_v3  ;;  %v3806_v22 = vld [vmem:[%s4971_s4 + $0xa8] sm:$0xff]  ;;  %v3783_v24 = vld [vmem:[%s4971_s4] sm:$0xff]  ;;  %v3817_v27 = vld [vmem:[%s4971_s4 + $0xf8] sm:$0xff] }
  0x2f   : > { %944 = vmatpush.bf16.msrb.mxu0 %v3781_v0  ;;  %1018 = vmatpush.bf16.msrb.mxu1 %v3808_v8  ;;  %v3805_v25 = vld [vmem:[%s4971_s4 + $0xa0] sm:$0xff]  ;;  %v3803_v28 = vld [vmem:[%s4971_s4 + $0x90] sm:$0xff]  ;;  %v3815_v30 = vld [vmem:[%s4971_s4 + $0xe8] sm:$0xff] }
  0x30   : > { %853 = vmatpush.bf16.msra.mxu2 %v3797_v9  ;;  %v3816_v29 = vld [vmem:[%s4971_s4 + $0xf0] sm:$0xff]  ;;  %v3802_v31 = vld [vmem:[%s4971_s4 + $0x88] sm:$0xff]  ;;  %v3801_v32 = vld [vmem:[%s4971_s4 + $0x80] sm:$0xff] }
  0x31   : > { %915 = vmatpush.bf16.msra.mxu3 %v3788_v10  ;;  %v3814_v33 = vld [vmem:[%s4971_s4 + $0xe0] sm:$0xff]  ;;  %v3813_v34 = vld [vmem:[%s4971_s4 + $0xd8] sm:$0xff]  ;;  %v3812_v35 = vld [vmem:[%s4971_s4 + $0xd0] sm:$0xff] }
  0x32   : > { %v3811_v38 = vld [vmem:[%s4971_s4 + $0xc8] sm:$0xff]  ;;  %v3810_v39 = vld [vmem:[%s4971_s4 + $0xc0] sm:$0xff]  ;;  %v1172_v50 = vld [vmem:[%s4972_s24 + $0x78] sm:$0xff] }
  0x33   : > { %945 = vmatpush.bf16.msrb.mxu0 %v3780_v1  ;;  %1019 = vmatpush.bf16.msrb.mxu1 %v3807_v19  ;;  %v1171_v51 = vld [vmem:[%s4972_s24 + $0x70] sm:$0xff]  ;;  %v1170_v52 = vld [vmem:[%s4972_s24 + $0x68] sm:$0xff]  ;;  %v1169_v53 = vld [vmem:[%s4972_s24 + $0x60] sm:$0xff] }
  0x34   : > { %854 = vmatpush.bf16.msra.mxu2 %v3796_v11  ;;  %v1168_v54 = vld [vmem:[%s4972_s24 + $0x58] sm:$0xff]  ;;  %v1167_v55 = vld [vmem:[%s4972_s24 + $0x50] sm:$0xff]  ;;  %v1166_v56 = vld [vmem:[%s4972_s24 + $0x48] sm:$0xff] }
  0x35   : > { %916 = vmatpush.bf16.msra.mxu3 %v3787_v12  ;;  %v1165_v57 = vld [vmem:[%s4972_s24 + $0x40] sm:$0xff]  ;;  %v1164_v58 = vld [vmem:[%s4972_s24 + $0x38] sm:$0xff]  ;;  %v1163_v59 = vld [vmem:[%s4972_s24 + $0x30] sm:$0xff] }
  0x36   : > { %v1162_v60 = vld [vmem:[%s4972_s24 + $0x28] sm:$0xff]  ;;  %v1161_v62 = vld [vmem:[%s4972_s24 + $0x20] sm:$0xff]  ;;  %v1160_v63 = vld [vmem:[%s4972_s24 + $0x18] sm:$0xff] }
  0x37   : > { %1051 = vmatpush.bf16.msra.mxu0 %v3781_v0  ;;  %1020 = vmatpush.bf16.msrb.mxu1 %v3806_v22  ;;  %v1159_v0 = vld [vmem:[%s4972_s24 + $0x10] sm:$0xff]  ;;  %v1157_v2 = vld [vmem:[%s4972_s24] sm:$0xff] }
  0x38   : > { %855 = vmatpush.bf16.msra.mxu2 %v3795_v14 }
  0x39   : > { %917 = vmatpush.bf16.msra.mxu3 %v3786_v15 }
  0x3b   : > { %1052 = vmatpush.bf16.msra.mxu0 %v3780_v1  ;;  %1021 = vmatpush.bf16.msrb.mxu1 %v3805_v25  ;;  %v1158_v1 = vld [vmem:[%s4972_s24 + $0x8] sm:$0xff] }
  0x3c   : > { %856 = vmatpush.bf16.msra.mxu2 %v3794_v17 }
  0x3d   : > { %918 = vmatpush.bf16.msra.mxu3 %v3785_v18 }
  0x3e   : > { %3119 = vmatmul.msk.bf16.vlgmr.msrb.gmra.mxu0 %vm725_vm0, %v3800_v13 }
  0x3f   : > { %1022 = vmatpush.bf16.msrb.mxu1 %v3804_v26  ;;  %1194 = vmatpush.msrb.mxu0 %v1172_v50 }
  0x40   : > { %857 = vmatpush.bf16.msra.mxu2 %v3793_v20 }
  0x41   : > { %919 = vmatpush.bf16.msra.mxu3 %v3784_v21  ;;  %1195 = vmatpush.msrb.mxu0 %v1171_v51 }
  0x43   : > { %1023 = vmatpush.bf16.msrb.mxu1 %v3803_v28  ;;  %1196 = vmatpush.msrb.mxu0 %v1170_v52 }
  0x44   : > { %858 = vmatpush.bf16.msra.mxu2 %v3792_v23 }
  0x45   : > { %920 = vmatpush.bf16.msra.mxu3 %v3783_v24  ;;  %1197 = vmatpush.msrb.mxu0 %v1169_v53 }
  0x47   : > { %1024 = vmatpush.bf16.msrb.mxu1 %v3802_v31  ;;  %1198 = vmatpush.msrb.mxu0 %v1168_v54 }
  0x48   : > { %1125 = vmatpush.bf16.msrb.mxu2 %v3817_v27 }
  0x49   : > { %1173 = vmatpush.msrb.mxu3 %v1172_v50  ;;  %1199 = vmatpush.msrb.mxu0 %v1167_v55  ;;  %v1254_v50 = vld [vmem:[%s4973_s23] sm:$0x1] }
  0x4b   : > { %1025 = vmatpush.bf16.msrb.mxu1 %v3801_v32  ;;  %1174 = vmatpush.msrb.mxu3 %v1171_v51  ;;  %v1229_v32 = vld [vmem:[#allocation2] sm:$0xff] }
  0x4c   : > { %1126 = vmatpush.bf16.msrb.mxu2 %v3816_v29  ;;  %1200 = vmatpush.msrb.mxu0 %v1166_v56 }
  0x4d   : > { %1175 = vmatpush.msrb.mxu3 %v1170_v52 }
  0x4e   : > { %3174 = vmatmul.msk.bf16.vlgmr.msra.gmra.mxu0 %vm725_vm0, %v3809_v16 }
  0x4f   : > { %1176 = vmatpush.msrb.mxu3 %v1169_v53  ;;  %1201 = vmatpush.msrb.mxu0 %v1165_v57 }
  0x50   : > { %1127 = vmatpush.bf16.msrb.mxu2 %v3815_v30  ;;  %1249 = vmatpush.msra.mxu1 %v1229_v32 }
  0x51   : > { %1177 = vmatpush.msrb.mxu3 %v1168_v54  ;;  %1202 = vmatpush.msrb.mxu0 %v1164_v58 }
  0x53   : > { %1178 = vmatpush.msrb.mxu3 %v1167_v55  ;;  %1203 = vmatpush.msrb.mxu0 %v1163_v59 }
  0x54   : > { %1128 = vmatpush.bf16.msrb.mxu2 %v3814_v33 }
  0x55   : > { %1179 = vmatpush.msrb.mxu3 %v1166_v56  ;;  %1204 = vmatpush.msrb.mxu0 %v1162_v60 }
  0x57   : > { %1180 = vmatpush.msrb.mxu3 %v1165_v57  ;;  %1205 = vmatpush.msrb.mxu0 %v1161_v62 }
  0x58   : > { %1129 = vmatpush.bf16.msrb.mxu2 %v3813_v34 }
  0x59   : > { %1181 = vmatpush.msrb.mxu3 %v1164_v58  ;;  %1206 = vmatpush.msrb.mxu0 %v1160_v63 }
  0x5b   : > { %1182 = vmatpush.msrb.mxu3 %v1163_v59  ;;  %1207 = vmatpush.msrb.mxu0 %v1159_v0 }
  0x5c   : > { %1130 = vmatpush.bf16.msrb.mxu2 %v3812_v35 }
  0x5d   : > { %1183 = vmatpush.msrb.mxu3 %v1162_v60  ;;  %1208 = vmatpush.msrb.mxu0 %v1158_v1 }
  0x5f   : > { %1184 = vmatpush.msrb.mxu3 %v1161_v62  ;;  %1209 = vmatpush.msrb.mxu0 %v1157_v2 }
  0x60   : > { %1131 = vmatpush.bf16.msrb.mxu2 %v3811_v38 }
  0x61   : > { %1185 = vmatpush.msrb.mxu3 %v1160_v63 }
  0x63   : > { %1186 = vmatpush.msrb.mxu3 %v1159_v0  ;;  %v1293_v0 = vld [vmem:[%s4940_s6] sm:$0xf] }
  0x64   : > { %1132 = vmatpush.bf16.msrb.mxu2 %v3810_v39 }
  0x65   : > { %1187 = vmatpush.msrb.mxu3 %v1158_v1  ;;  %v3226_v1 = vld [vmem:[%s4940_s6 + $0x4] sm:$0xf] }
  0x67   : > { %1188 = vmatpush.msrb.mxu3 %v1157_v2  ;;  %v3825_v2 = vld [vmem:[%s4941_s7 + $0x38] sm:$0xff] }
  0x68   : > { %1473 = vmatpush.bf16.msra.mxu0 %v3825_v2  ;;  %v1695_v2 = vld [vmem:[%s4942_s8] sm:$0xff] }
  0xab   : > { %v738_v36 = vpop.f32.mrf.mxu0  ;;  %v780_v37 = vpop.f32.mrf.mxu1 }
  0xb3   : > { %v740_v40 = vpop.f32.mrf.mxu0  ;;  %v782_v41 = vpop.f32.mrf.mxu1 }
  0xb4   : > { %v743_v42 = vpack.c.bf16 %v740_v40, %v738_v36  ;;  %v785_v43 = vpack.c.bf16 %v782_v41, %v780_v37 }
  0xb6   : > { %859 = vmatmul.bf16.vlgmr.msra.gmra.mxu2 %v785_v43  ;;  %921 = vmatmul.bf16.vlgmr.msra.gmra.mxu3 %v743_v42 }
  0xbb   : > { %v947_v44 = vpop.f32.mrf.mxu0 }
  0xc3   : > { %v949_v45 = vpop.f32.mrf.mxu0 }
  0xc4   : > { %v952_v46 = vpack.c.bf16 %v949_v45, %v947_v44 }
  0xc6   : > { %1026 = vmatmul.bf16.vlgmr.msrb.gmra.mxu1 %v952_v46 }
  0xc7   : > { %1274 = vmatpush.msrb.mxu1 %v1229_v32  ;;  %v3845_v32 = vld [vmem:[%s4941_s7 + $0xd8] sm:$0xff] }
  0xcb   : > { %v1054_v47 = vpop.f32.mrf.mxu0 }
  0xd3   : > { %v1056_v48 = vpop.f32.mrf.mxu0 }
  0xd4   : > { %v1059_v49 = vpack.c.bf16 %v1056_v48, %v1054_v47 }
  0xd6   : > { %1133 = vmatmul.bf16.vlgmr.msrb.gmra.mxu2 %v1059_v49 }
 0x139   : > { %v860_v61 = vpop.f32.mrf.mxu2  ;;  %v922_v3 = vpop.f32.mrf.mxu3 }
 0x13a   : > { %v923_v8 = vadd.f32 %v922_v3, %v860_v61  ;;  %v3833_v3 = vld [vmem:[%s4941_s7 + $0x78] sm:$0xff] }
 0x13b   : > { %1412 = vmatpush.bf16.msra.mxu2 %v3833_v3 }
 0x141   : > { %v862_v4 = vpop.f32.mrf.mxu2  ;;  %v924_v7 = vpop.f32.mrf.mxu3 }
 0x142   : > { %v925_v10 = vadd.f32 %v924_v7, %v862_v4  ;;  %v3824_v4 = vld [vmem:[%s4941_s7 + $0x30] sm:$0xff] }
 0x143   : > { %v1027_v5 = vpop.f32.mrf.mxu1  ;;  %v3840_v7 = vld [vmem:[%s4941_s7 + $0xb0] sm:$0xff]  ;;  %1474 = vmatpush.bf16.msra.mxu0 %v3824_v4 }
 0x144   : > { %v1032_v11 = vadd.f32 %v1027_v5, %v923_v8  ;;  %v3832_v5 = vld [vmem:[%s4941_s7 + $0x70] sm:$0xff]  ;;  %v3823_v8 = vld [vmem:[%s4941_s7 + $0x28] sm:$0xff] }
 0x145   : > { %1413 = vmatpush.bf16.msra.mxu2 %v3832_v5 }
 0x147   : > { %1475 = vmatpush.bf16.msra.mxu0 %v3823_v8 }
 0x14b   : > { %v1029_v9 = vpop.f32.mrf.mxu1 }
 0x14c   : > { %v1033_v12 = vadd.f32 %v1029_v9, %v925_v10  ;;  %v3831_v9 = vld [vmem:[%s4941_s7 + $0x68] sm:$0xff] }
 0x14d   : > { %v3839_v10 = vld [vmem:[%s4941_s7 + $0xa8] sm:$0xff]  ;;  %1414 = vmatpush.bf16.msra.mxu2 %v3831_v9 }
 0x159   : > { %v1134_v6 = vpop.f32.mrf.mxu2 }
 0x15a   : > { %v1139_v13 = vadd.f32 %v1134_v6, %v1032_v11  ;;  %v3841_v6 = vld [vmem:[%s4941_s7 + $0xb8] sm:$0xff]  ;;  %v3822_v11 = vld [vmem:[%s4941_s7 + $0x20] sm:$0xff] }
 0x15b   : > { %1476 = vmatpush.bf16.msra.mxu0 %v3822_v11 }
 0x15c   : > { %v1148_v16 = vmul.f32 %v1139_v13, %v1139_v13 }
 0x161   : > { %v1136_v14 = vpop.f32.mrf.mxu2 }
 0x162   : > { %v1140_v15 = vadd.f32 %v1136_v14, %v1033_v12  ;;  %v3830_v12 = vld [vmem:[%s4941_s7 + $0x60] sm:$0xff]  ;;  %v3821_v14 = vld [vmem:[%s4941_s7 + $0x18] sm:$0xff] }
 0x163   : > { %1415 = vmatpush.bf16.msra.mxu2 %v3830_v12  ;;  %1477 = vmatpush.bf16.msra.mxu0 %v3821_v14 }
 0x164   : > { %v1141_v17 = vadd.f32 %v1140_v15, %v1139_v13  ;;  %v1149_v18 = vmul.f32 %v1140_v15, %v1140_v15 }
 0x166   : > { %v1142_v19 = vrot.slane %v1141_v17, 4  ;;  %v1150_v20 = vadd.f32 %v1149_v18, %v1148_v16  ;;  %v3820_v16 = vld [vmem:[%s4941_s7 + $0x10] sm:$0xff]  ;;  %v3819_v18 = vld [vmem:[%s4941_s7 + $0x8] sm:$0xff] }
 0x167   : > { %1478 = vmatpush.bf16.msra.mxu0 %v3820_v16 }
 0x168   : > { %v1143_v21 = vadd.f32 %v1142_v19, %v1141_v17  ;;  %v1151_v22 = vrot.slane %v1150_v20, 4  ;;  %v3828_v17 = vld [vmem:[%s4941_s7 + $0x50] sm:$0xff]  ;;  %v3827_v19 = vld [vmem:[%s4941_s7 + $0x48] sm:$0xff] }
 0x16a   : > { %v1152_v23 = vadd.f32 %v1151_v22, %v1150_v20  ;;  %v1144_v24 = vrot.slane %v1143_v21, 2  ;;  %v3358_v20 = vld [vmem:[%s4940_s6 + $0xc] sm:$0xf]  ;;  %v3838_v22 = vld [vmem:[%s4941_s7 + $0xa0] sm:$0xff] }
 0x16b   : > { %1479 = vmatpush.bf16.msra.mxu0 %v3819_v18 }
 0x16c   : > { %v1153_v25 = vrot.slane %v1152_v23, 2  ;;  %v1145_v26 = vadd.f32 %v1144_v24, %v1143_v21  ;;  %v3818_v21 = vld [vmem:[%s4941_s7] sm:$0xff]  ;;  %v3837_v24 = vld [vmem:[%s4941_s7 + $0x98] sm:$0xff] }
 0x16e   : > { %v1146_v27 = vrot.slane %v1145_v26, 1  ;;  %v1154_v28 = vadd.f32 %v1153_v25, %v1152_v23  ;;  %v3826_v23 = vld [vmem:[%s4941_s7 + $0x40] sm:$0xff]  ;;  %v3849_v25 = vld [vmem:[%s4941_s7 + $0xf8] sm:$0xff] }
 0x16f   : > { %1480 = vmatpush.bf16.msra.mxu0 %v3818_v21 }
 0x170   : > { %v1147_v29 = vadd.f32 %v1146_v27, %v1145_v26  ;;  %v1155_v30 = vrot.slane %v1154_v28, 1  ;;  %v3836_v26 = vld [vmem:[%s4941_s7 + $0x90] sm:$0xff] }
 0x171   : > { %v3848_v27 = vld [vmem:[%s4941_s7 + $0xf0] sm:$0xff] }
 0x172   : > { %1189 = vmatmul.f32.vlgmr.msrb.gmra.mxu3 %v1147_v29  ;;  %v1156_v31 = vadd.f32 %v1155_v30, %v1154_v28  ;;  %v3835_v28 = vld [vmem:[%s4941_s7 + $0x88] sm:$0xff]  ;;  %v3834_v30 = vld [vmem:[%s4941_s7 + $0x80] sm:$0xff] }
 0x173   : > { %v3847_v29 = vld [vmem:[%s4941_s7 + $0xe8] sm:$0xff] }
 0x174   : > { %1210 = vmatmul.f32.vlgmr.msrb.gmra.mxu0 %v1156_v31  ;;  %v3846_v31 = vld [vmem:[%s4941_s7 + $0xe0] sm:$0xff] }
 0x1f1   : > { %v1211_v33 = vpop.f32.mrf.mxu0 }
 0x1f2   : > { %v1214_v36 = vmul.f32 0.00390625, %v1211_v33  ;;  %v3844_v33 = vld [vmem:[%s4941_s7 + $0xd0] sm:$0xff] }
 0x1f5   : > { %v1190_v34 = vpop.f32.mrf.mxu3 }
 0x1f6   : > { %v1193_v35 = vmul.f32 0.00390625, %v1190_v34  ;;  %v3843_v34 = vld [vmem:[%s4941_s7 + $0xc8] sm:$0xff] }
 0x1f8   : > { %v1215_v37 = vmul.f32 %v1193_v35, %v1193_v35 }
 0x1fa   : > { %v1216_v38 = vsub.f32 %v1214_v36, %v1215_v37 }
 0x1fc   : > { %v1217_v39 = vmax.f32 %v1216_v38, 0.0 }
 0x1fe   : > { %v1218_v40 = vadd.f32 1e-05, %v1217_v39 }
 0x200   : > { %3955 = vrsqrt.f32 %v1218_v40  ;;  %vm1225_vm2 = vweird.f32 %v1218_v40 }
 0x206   : > { %v3956_v41 = vpop.eup %3955 }
 0x207   : > { %v1220_v42 = vmul.f32 %v3956_v41, %v1218_v40  ;;  %vm1226_vm1 = vweird.f32 %v3956_v41 }
 0x208   : > { %vm1227_vm4 = vmor %vm1225_vm2, %vm1226_vm1  ;;  %vm2856_vm1 = vcmask 523264  }
 0x209   : > { %v1221_v43 = vmul.f32 %v3956_v41, %v1220_v42 }
 0x20b   : > { %v1222_v44 = vmul.f32 0.5, %v1221_v43 }
 0x20d   : > { %v1223_v45 = vsub.f32 1.5, %v1222_v44 }
 0x20f   : > { %v1224_v46 = vmul.f32 %v3956_v41, %v1223_v45 }
 0x211   : > { %v1228_v47 = vsel %vm1227_vm4, %v3956_v41, %v1224_v46 }
 0x212   : > { %3223 = vmatmul.msk.f32.vlgmr.msra.gmra.mxu1 %vm1230_vm3, %v1228_v47  ;;  %v1255_v48 = vmul.f32 %v1228_v47, %v1193_v35  ;;  %v3842_v35 = vld [vmem:[%s4941_s7 + $0xc0] sm:$0xff] }
 0x21a   : > { %3224 = vmatmul.msk.f32.vlgmr.msrb.gmra.mxu1 %vm1230_vm3, %v1255_v48  ;;  %v1710_v48 = vld [vmem:[%s4942_s8 + $0x78] sm:$0xff] }
 0x21b   : > { %1711 = vmatpush.msrb.mxu0 %v1710_v48 }
 0x28f   : > { %v1251_v49 = vpop.f32.mrf.mxu1 }
 0x290   : > { %v1280_v51 = vperm.slane %v1251_v49, 0  ;;  %v1709_v49 = vld [vmem:[%s4942_s8 + $0x70] sm:$0xff] }
 0x291   : > { %1712 = vmatpush.msrb.mxu0 %v1709_v49 }
 0x292   : > { %v1281_v54 = vmul.f32 %v1280_v51, %v1139_v13  ;;  %v1282_v55 = vmul.f32 %v1280_v51, %v1140_v15  ;;  %v3308_v13 = vld [vmem:[%s4940_s6 + $0x8] sm:$0xf]  ;;  %v3829_v15 = vld [vmem:[%s4941_s7 + $0x58] sm:$0xff]  ;;  %v1707_v51 = vld [vmem:[%s4942_s8 + $0x60] sm:$0xff] }
 0x293   : > { %1416 = vmatpush.bf16.msra.mxu2 %v3829_v15 }
 0x297   : > { %v1276_v52 = vpop.f32.mrf.mxu1  ;;  %1417 = vmatpush.bf16.msra.mxu2 %v3828_v17 }
 0x298   : > { %v1279_v53 = vsub.f32 %v1254_v50, %v1276_v52  ;;  %v1708_v50 = vld [vmem:[%s4942_s8 + $0x68] sm:$0xff]  ;;  %v1706_v52 = vld [vmem:[%s4942_s8 + $0x58] sm:$0xff] }
 0x299   : > { %1713 = vmatpush.msrb.mxu0 %v1708_v50 }
 0x29a   : > { %v1284_v56 = vperm.slane %v1279_v53, 0  ;;  %v1705_v53 = vld [vmem:[%s4942_s8 + $0x50] sm:$0xff] }
 0x29b   : > { %1418 = vmatpush.bf16.msra.mxu2 %v3827_v19  ;;  %1714 = vmatpush.msrb.mxu0 %v1707_v51 }
 0x29c   : > { %v1286_v57 = vadd.f32 %v1284_v56, %v1281_v54  ;;  %v1287_v58 = vadd.f32 %v1284_v56, %v1282_v55  ;;  %v1704_v54 = vld [vmem:[%s4942_s8 + $0x48] sm:$0xff]  ;;  %v1703_v56 = vld [vmem:[%s4942_s8 + $0x40] sm:$0xff] }
 0x29d   : > { %1715 = vmatpush.msrb.mxu0 %v1706_v52 }
 0x29e   : > { %v1288_v59 = vmul.f32 0.01, %v1286_v57  ;;  %v1289_v60 = vmul.f32 0.01, %v1287_v58 }
 0x29f   : > { %1419 = vmatpush.bf16.msra.mxu2 %v3826_v23  ;;  %1716 = vmatpush.msrb.mxu0 %v1705_v53 }
 0x2a0   : > { %v1290_v61 = vmax.f32 %v1286_v57, %v1288_v59  ;;  %v1291_v62 = vmax.f32 %v1287_v58, %v1289_v60  ;;  %v1702_v57 = vld [vmem:[%s4942_s8 + $0x38] sm:$0xff]  ;;  %v1701_v58 = vld [vmem:[%s4942_s8 + $0x30] sm:$0xff]  ;;  %v1700_v60 = vld [vmem:[%s4942_s8 + $0x28] sm:$0xff] }
 0x2a1   : > { %1717 = vmatpush.msrb.mxu0 %v1704_v54 }
 0x2a2   : > { %v1292_v63 = vpack.c.bf16 %v1291_v62, %v1290_v61  ;;  %v1699_v61 = vld [vmem:[%s4942_s8 + $0x20] sm:$0xff] }
 0x2a3   : > { %1668 = vmatpush.bf16.msrb.mxu2 %v3849_v25  ;;  %1718 = vmatpush.msrb.mxu0 %v1703_v56  ;;  %v1767_v25 = vld [vmem:[%s4943_s9] sm:$0xff] }
 0x2a4   : > { %1305 = vmatpush.bf16.msra.mxu1 %v1292_v63  ;;  %1340 = vmatpush.bf16.msra.mxu3 %v1292_v63 }
 0x2a5   : > { %1719 = vmatpush.msrb.mxu0 %v1702_v57 }
 0x2a7   : > { %3225 = vmatmul.msk.bf16.vlgmr.msra.gmra.mxu1 %vm1294_vm5, %v1293_v0  ;;  %3227 = vmatmul.msk.bf16.vlgmr.msra.gmra.mxu3 %vm1294_vm5, %v3226_v1  ;;  %v1697_v0 = vld [vmem:[%s4942_s8 + $0x10] sm:$0xff]  ;;  %v1696_v1 = vld [vmem:[%s4942_s8 + $0x8] sm:$0xff] }
 0x2a8   : > { %1498 = vmatpush.bf16.msrb.mxu1 %v1292_v63  ;;  %1570 = vmatpush.bf16.msrb.mxu3 %v3841_v6 }
 0x2a9   : > { %1669 = vmatpush.bf16.msrb.mxu2 %v3848_v27  ;;  %1720 = vmatpush.msrb.mxu0 %v1701_v58 }
 0x2ab   : > { %1721 = vmatpush.msrb.mxu0 %v1700_v60 }
 0x2ac   : > { %1596 = vmatpush.bf16.msra.mxu1 %v1292_v63  ;;  %1571 = vmatpush.bf16.msrb.mxu3 %v3840_v7  ;;  %v1698_v63 = vld [vmem:[%s4942_s8 + $0x18] sm:$0xff] }
 0x2ad   : > { %1670 = vmatpush.bf16.msrb.mxu2 %v3847_v29  ;;  %1722 = vmatpush.msrb.mxu0 %v1699_v61 }
 0x2af   : > { %1723 = vmatpush.msrb.mxu0 %v1698_v63 }
 0x2b0   : > { %1572 = vmatpush.bf16.msrb.mxu3 %v3839_v10 }
 0x2b1   : > { %1671 = vmatpush.bf16.msrb.mxu2 %v3846_v31  ;;  %1724 = vmatpush.msrb.mxu0 %v1697_v0 }
 0x2b3   : > { %1725 = vmatpush.msrb.mxu0 %v1696_v1 }
 0x2b4   : > { %1573 = vmatpush.bf16.msrb.mxu3 %v3838_v22 }
 0x2b5   : > { %1672 = vmatpush.bf16.msrb.mxu2 %v3845_v32  ;;  %1726 = vmatpush.msrb.mxu0 %v1695_v2 }
 0x2b7   : > { %3309 = vmatmul.msk.bf16.vlgmr.msrb.gmra.mxu1 %vm1294_vm5, %v3308_v13 }
 0x2b8   : > { %1574 = vmatpush.bf16.msrb.mxu3 %v3837_v24  ;;  %1732 = vmatpush.msrb.mxu1 %v1710_v48  ;;  %v1768_v24 = vld [vmem:[%s4943_s9 + $0x8] sm:$0xff] }
 0x2b9   : > { %1673 = vmatpush.bf16.msrb.mxu2 %v3844_v33 }
 0x2ba   : > { %1733 = vmatpush.msrb.mxu1 %v1709_v49 }
 0x2bc   : > { %1575 = vmatpush.bf16.msrb.mxu3 %v3836_v26  ;;  %1734 = vmatpush.msrb.mxu1 %v1708_v50 }
 0x2bd   : > { %1674 = vmatpush.bf16.msrb.mxu2 %v3843_v34 }
 0x2be   : > { %1735 = vmatpush.msrb.mxu1 %v1707_v51 }
 0x2c0   : > { %1576 = vmatpush.bf16.msrb.mxu3 %v3835_v28  ;;  %1736 = vmatpush.msrb.mxu1 %v1706_v52 }
 0x2c1   : > { %1675 = vmatpush.bf16.msrb.mxu2 %v3842_v35 }
 0x2c2   : > { %1737 = vmatpush.msrb.mxu1 %v1705_v53 }
 0x2c4   : > { %1577 = vmatpush.bf16.msrb.mxu3 %v3834_v30  ;;  %1738 = vmatpush.msrb.mxu1 %v1704_v54  ;;  %v1827_v54 = vld [vmem:[#allocation6] sm:$0x3] }
 0x2c6   : > { %1739 = vmatpush.msrb.mxu1 %v1703_v56  ;;  %v3865_v56 = vld [vmem:[%s4946_s12 + $0x78] sm:$0xff] }
 0x2c7   : > { %3359 = vmatmul.msk.bf16.vlgmr.msra.gmra.mxu1 %vm1294_vm5, %v3358_v20 }
 0x2c8   : > { %1740 = vmatpush.msrb.mxu1 %v1702_v57  ;;  %1786 = vmatpush.msra.mxu3 %v1768_v24  ;;  %v3857_v57 = vld [vmem:[%s4946_s12 + $0x38] sm:$0xff] }
 0x2ca   : > { %1741 = vmatpush.msrb.mxu1 %v1701_v58  ;;  %1787 = vmatpush.msra.mxu3 %v1767_v25  ;;  %v3864_v58 = vld [vmem:[%s4946_s12 + $0x70] sm:$0xff] }
 0x2cc   : > { %1742 = vmatpush.msrb.mxu1 %v1700_v60  ;;  %v3873_v60 = vld [vmem:[%s4946_s12 + $0xb8] sm:$0xff] }
 0x2ce   : > { %1743 = vmatpush.msrb.mxu1 %v1699_v61  ;;  %v3872_v61 = vld [vmem:[%s4946_s12 + $0xb0] sm:$0xff] }
 0x2d0   : > { %1744 = vmatpush.msrb.mxu1 %v1698_v63  ;;  %v3855_v63 = vld [vmem:[%s4946_s12 + $0x28] sm:$0xff] }
 0x2d2   : > { %1745 = vmatpush.msrb.mxu1 %v1697_v0  ;;  %v3862_v0 = vld [vmem:[%s4946_s12 + $0x60] sm:$0xff] }
 0x2d4   : > { %1746 = vmatpush.msrb.mxu1 %v1696_v1  ;;  %v3854_v1 = vld [vmem:[%s4946_s12 + $0x20] sm:$0xff] }
 0x2d6   : > { %1747 = vmatpush.msrb.mxu1 %v1695_v2  ;;  %v2024_v2 = vld [vmem:[#allocation6 + $0x4] sm:$0x3] }
 0x2d8   : > { %2010 = vmatpush.bf16.msra.mxu1 %v3857_v57  ;;  %v2235_v57 = vld [vmem:[%s4947_s13 + $0x8] sm:$0xff] }
 0x324   : > { %v1307_v36 = vpop.f32.mrf.mxu1 }
 0x325   : > { %v1311_v37 = vpack.c.bf16 %v1307_v36, %v1307_v36 }
 0x327   : > { %1481 = vmatmul.bf16.vlgmr.msra.gmra.mxu0 %v1311_v37 }
 0x32a   : > { %v1342_v38 = vpop.f32.mrf.mxu3 }
 0x32b   : > { %v1346_v39 = vpack.c.bf16 %v1342_v38, %v1342_v38 }
 0x32c   : > { %v1309_v40 = vpop.f32.mrf.mxu1 }
 0x32d   : > { %1420 = vmatmul.bf16.vlgmr.msra.gmra.mxu2 %v1346_v39 }
 0x32e   : > { %1949 = vmatpush.bf16.msra.mxu2 %v3865_v56  ;;  %v2236_v56 = vld [vmem:[%s4947_s13 + $0x10] sm:$0xff] }
 0x332   : > { %v1344_v41 = vpop.f32.mrf.mxu3  ;;  %1950 = vmatpush.bf16.msra.mxu2 %v3864_v58  ;;  %v2234_v58 = vld [vmem:[%s4947_s13] sm:$0xff] }
 0x334   : > { %v1500_v42 = vpop.f32.mrf.mxu1 }
 0x335   : > { %v1504_v43 = vpack.c.bf16 %v1500_v42, %v1500_v42 }
 0x337   : > { %1578 = vmatmul.bf16.vlgmr.msrb.gmra.mxu3 %v1504_v43  ;;  %v1792_v43 = vld [vmem:[#allocation4] sm:$0x1] }
 0x338   : > { %1811 = vmatpush.msrb.mxu3 %v1768_v24  ;;  %v3875_v24 = vld [vmem:[%s4946_s12 + $0xc8] sm:$0xff] }
 0x33a   : > { %1812 = vmatpush.msrb.mxu3 %v1767_v25 }
 0x33c   : > { %v1502_v44 = vpop.f32.mrf.mxu1 }
 0x344   : > { %v1598_v45 = vpop.f32.mrf.mxu1 }
 0x345   : > { %v1602_v46 = vpack.c.bf16 %v1598_v45, %v1598_v45 }
 0x347   : > { %1676 = vmatmul.bf16.vlgmr.msrb.gmra.mxu2 %v1602_v46 }
 0x34c   : > { %v1600_v47 = vpop.f32.mrf.mxu1 }
 0x3a4   : > { %v1482_v55 = vpop.f32.mrf.mxu0 }
 0x3ac   : > { %v1484_v59 = vpop.f32.mrf.mxu0 }
 0x3ad   : > { %v3856_v59 = vld [vmem:[%s4946_s12 + $0x30] sm:$0xff] }
 0x3ae   : > { %2011 = vmatpush.bf16.msra.mxu1 %v3856_v59 }
 0x3b0   : > { %v1421_v62 = vpop.f32.mrf.mxu2 }
 0x3b1   : > { %v1483_v6 = vadd.f32 %v1482_v55, %v1421_v62  ;;  %v1866_v55 = vld [vmem:[#allocation6 + $0x2] sm:$0x3] }
 0x3b2   : > { %v3863_v62 = vld [vmem:[%s4946_s12 + $0x68] sm:$0xff]  ;;  %2012 = vmatpush.bf16.msra.mxu1 %v3855_v63 }
 0x3b3   : > { %1951 = vmatpush.bf16.msra.mxu2 %v3863_v62 }
 0x3b6   : > { %2013 = vmatpush.bf16.msra.mxu1 %v3854_v1 }
 0x3b7   : > { %1952 = vmatpush.bf16.msra.mxu2 %v3862_v0 }
 0x3b8   : > { %v1423_v3 = vpop.f32.mrf.mxu2 }
 0x3b9   : > { %v3861_v3 = vld [vmem:[%s4946_s12 + $0x58] sm:$0xff] }
 0x3ba   : > { %v1579_v4 = vpop.f32.mrf.mxu3 }
 0x3bb   : > { %v1583_v7 = vadd.f32 %v1579_v4, %v1483_v6  ;;  %v3853_v4 = vld [vmem:[%s4946_s12 + $0x18] sm:$0xff]  ;;  %1953 = vmatpush.bf16.msra.mxu2 %v3861_v3  ;;  %v3852_v6 = vld [vmem:[%s4946_s12 + $0x10] sm:$0xff] }
 0x3bc   : > { %2014 = vmatpush.bf16.msra.mxu1 %v3853_v4 }
 0x3c0   : > { %2015 = vmatpush.bf16.msra.mxu1 %v3852_v6 }
 0x3c2   : > { %v1581_v5 = vpop.f32.mrf.mxu3 }
 0x3c3   : > { %v3860_v5 = vld [vmem:[%s4946_s12 + $0x50] sm:$0xff] }
 0x3c4   : > { %1954 = vmatpush.bf16.msra.mxu2 %v3860_v5 }
 0x3ca   : > { %v1677_v8 = vpop.f32.mrf.mxu2 }
 0x3cb   : > { %v1681_v9 = vadd.f32 %v1677_v8, %v1583_v7  ;;  %v3859_v7 = vld [vmem:[%s4946_s12 + $0x48] sm:$0xff]  ;;  %v2122_v8 = vld [vmem:[#allocation6 + $0x6] sm:$0x3] }
 0x3cc   : > { %1955 = vmatpush.bf16.msra.mxu2 %v3859_v7 }
 0x3cd   : > { %v1682_v10 = vrot.slane %v1681_v9, 4  ;;  %v1688_v11 = vmul.f32 %v1681_v9, %v1681_v9 }
 0x3cf   : > { %v1683_v12 = vadd.f32 %v1682_v10, %v1681_v9  ;;  %v1689_v13 = vrot.slane %v1688_v11, 4  ;;  %v3851_v10 = vld [vmem:[%s4946_s12 + $0x8] sm:$0xff] }
 0x3d0   : > { %2016 = vmatpush.bf16.msra.mxu1 %v3851_v10 }
 0x3d1   : > { %v1684_v14 = vrot.slane %v1683_v12, 2  ;;  %v1690_v15 = vadd.f32 %v1689_v13, %v1688_v11  ;;  %v3871_v11 = vld [vmem:[%s4946_s12 + $0xa8] sm:$0xff]  ;;  %v3870_v13 = vld [vmem:[%s4946_s12 + $0xa0] sm:$0xff] }
 0x3d2   : > { %v1679_v16 = vpop.f32.mrf.mxu2 }
 0x3d3   : > { %v1685_v17 = vadd.f32 %v1684_v14, %v1683_v12  ;;  %v1691_v18 = vrot.slane %v1690_v15, 2  ;;  %v3850_v12 = vld [vmem:[%s4946_s12] sm:$0xff]  ;;  %v3869_v14 = vld [vmem:[%s4946_s12 + $0x98] sm:$0xff]  ;;  %v3868_v16 = vld [vmem:[%s4946_s12 + $0x90] sm:$0xff] }
 0x3d4   : > { %2017 = vmatpush.bf16.msra.mxu1 %v3850_v12 }
 0x3d5   : > { %v1686_v19 = vrot.slane %v1685_v17, 1  ;;  %v1692_v20 = vadd.f32 %v1691_v18, %v1690_v15  ;;  %v3881_v15 = vld [vmem:[%s4946_s12 + $0xf8] sm:$0xff]  ;;  %v3867_v18 = vld [vmem:[%s4946_s12 + $0x88] sm:$0xff] }
 0x3d7   : > { %v1687_v21 = vadd.f32 %v1686_v19, %v1685_v17  ;;  %v1693_v22 = vrot.slane %v1692_v20, 1  ;;  %v3880_v17 = vld [vmem:[%s4946_s12 + $0xf0] sm:$0xff]  ;;  %v3879_v19 = vld [vmem:[%s4946_s12 + $0xe8] sm:$0xff] }
 0x3d9   : > { %1727 = vmatmul.f32.vlgmr.msrb.gmra.mxu0 %v1687_v21  ;;  %v1694_v23 = vadd.f32 %v1693_v22, %v1692_v20  ;;  %v3866_v20 = vld [vmem:[%s4946_s12 + $0x80] sm:$0xff]  ;;  %v3877_v22 = vld [vmem:[%s4946_s12 + $0xd8] sm:$0xff] }
 0x3da   : > { %v3878_v21 = vld [vmem:[%s4946_s12 + $0xe0] sm:$0xff] }
 0x3db   : > { %1748 = vmatmul.f32.vlgmr.msrb.gmra.mxu1 %v1694_v23  ;;  %v3876_v23 = vld [vmem:[%s4946_s12 + $0xd0] sm:$0xff] }
 0x456   : > { %v1728_v26 = vpop.f32.mrf.mxu0 }
 0x457   : > { %v1731_v27 = vmul.f32 0.015625, %v1728_v26 }
 0x458   : > { %v1749_v28 = vpop.f32.mrf.mxu1 }
 0x459   : > { %v1753_v29 = vmul.f32 %v1731_v27, %v1731_v27  ;;  %v1752_v30 = vmul.f32 0.015625, %v1749_v28 }
 0x45b   : > { %v1754_v31 = vsub.f32 %v1752_v30, %v1753_v29 }
 0x45d   : > { %v1755_v32 = vmax.f32 %v1754_v31, 0.0 }
 0x45f   : > { %v1756_v33 = vadd.f32 1e-05, %v1755_v32 }
 0x461   : > { %3957 = vrsqrt.f32 %v1756_v33  ;;  %vm1763_vm7 = vweird.f32 %v1756_v33 }
 0x467   : > { %v3958_v34 = vpop.eup %3957 }
 0x468   : > { %v1758_v35 = vmul.f32 %v3958_v34, %v1756_v33  ;;  %vm1764_vm6 = vweird.f32 %v3958_v34 }
 0x469   : > { %vm1765_vm8 = vmor %vm1763_vm7, %vm1764_vm6 }
 0x46a   : > { %v1759_v36 = vmul.f32 %v3958_v34, %v1758_v35 }
 0x46c   : > { %v1760_v37 = vmul.f32 0.5, %v1759_v36 }
 0x46e   : > { %v1761_v38 = vsub.f32 1.5, %v1760_v37 }
 0x470   : > { %v1762_v39 = vmul.f32 %v3958_v34, %v1761_v38  ;;  %v2249_v38 = vld [vmem:[%s4947_s13 + $0x78] sm:$0xff] }
 0x471   : > { %2250 = vmatpush.msrb.mxu1 %v2249_v38 }
 0x472   : > { %v1766_v40 = vsel %vm1765_vm8, %v3958_v34, %v1762_v39  ;;  %v2248_v39 = vld [vmem:[%s4947_s13 + $0x70] sm:$0xff] }
 0x473   : > { %3408 = vmatmul.msk.f32.vlgmr.msra.gmra.mxu3 %vm1294_vm5, %v1766_v40  ;;  %v1793_v41 = vmul.f32 %v1766_v40, %v1731_v27  ;;  %v3874_v27 = vld [vmem:[%s4946_s12 + $0xc0] sm:$0xff]  ;;  %v2247_v40 = vld [vmem:[%s4947_s13 + $0x68] sm:$0xff]  ;;  %2251 = vmatpush.msrb.mxu1 %v2248_v39 }
 0x475   : > { %2252 = vmatpush.msrb.mxu1 %v2247_v40 }
 0x47b   : > { %3409 = vmatmul.msk.f32.vlgmr.msrb.gmra.mxu3 %vm1294_vm5, %v1793_v41  ;;  %v2246_v41 = vld [vmem:[%s4947_s13 + $0x60] sm:$0xff] }
 0x47c   : > { %2253 = vmatpush.msrb.mxu1 %v2246_v41 }
 0x4f6   : > { %v1789_v42 = vpop.f32.mrf.mxu3 }
 0x4f7   : > { %v1818_v44 = vperm.slane %v1789_v42, 0  ;;  %v2245_v42 = vld [vmem:[%s4947_s13 + $0x58] sm:$0xff] }
 0x4f8   : > { %2254 = vmatpush.msrb.mxu1 %v2245_v42 }
 0x4f9   : > { %v1819_v47 = vmul.f32 %v1818_v44, %v1681_v9  ;;  %v3858_v9 = vld [vmem:[%s4946_s12 + $0x40] sm:$0xff] }
 0x4fa   : > { %1956 = vmatpush.bf16.msra.mxu2 %v3858_v9 }
 0x4fe   : > { %v1814_v45 = vpop.f32.mrf.mxu3  ;;  %2205 = vmatpush.bf16.msrb.mxu2 %v3881_v15 }
 0x4ff   : > { %v1817_v46 = vsub.f32 %v1792_v43, %v1814_v45  ;;  %v2244_v43 = vld [vmem:[%s4947_s13 + $0x50] sm:$0xff] }
 0x500   : > { %2255 = vmatpush.msrb.mxu1 %v2244_v43 }
 0x501   : > { %v1821_v48 = vperm.slane %v1817_v46, 0  ;;  %v2243_v46 = vld [vmem:[%s4947_s13 + $0x48] sm:$0xff] }
 0x502   : > { %2206 = vmatpush.bf16.msrb.mxu2 %v3880_v17  ;;  %2256 = vmatpush.msrb.mxu1 %v2243_v46  ;;  %v2308_v17 = vld [vmem:[%s4948_s14 + $0x10] sm:$0xff] }
 0x503   : > { %v1823_v49 = vadd.f32 %v1821_v48, %v1819_v47  ;;  %v2242_v47 = vld [vmem:[%s4947_s13 + $0x40] sm:$0xff]  ;;  %v2241_v48 = vld [vmem:[%s4947_s13 + $0x38] sm:$0xff] }
 0x504   : > { %2257 = vmatpush.msrb.mxu1 %v2242_v47 }
 0x505   : > { %v1824_v50 = vmul.f32 0.01, %v1823_v49 }
 0x506   : > { %2207 = vmatpush.bf16.msrb.mxu2 %v3879_v19  ;;  %2258 = vmatpush.msrb.mxu1 %v2241_v48  ;;  %v2306_v19 = vld [vmem:[%s4948_s14] sm:$0xff] }
 0x507   : > { %v1825_v51 = vmax.f32 %v1823_v49, %v1824_v50 }
 0x509   : > { %v1826_v52 = vpack.c.bf16 %v1825_v51, %v1825_v51  ;;  %v2240_v51 = vld [vmem:[%s4947_s13 + $0x30] sm:$0xff] }
 0x50a   : > { %2208 = vmatpush.bf16.msrb.mxu2 %v3878_v21  ;;  %2259 = vmatpush.msrb.mxu1 %v2240_v51 }
 0x50b   : > { %v1833_v53 = vsel %vm1831_vm9, %v1826_v52, 0  ;;  %v2239_v52 = vld [vmem:[%s4947_s13 + $0x28] sm:$0xff] }
 0x50c   : > { %1842 = vmatpush.bf16.msra.mxu3 %v1833_v53  ;;  %1877 = vmatpush.bf16.msra.mxu0 %v1833_v53 }
 0x50d   : > { %2260 = vmatpush.msrb.mxu1 %v2239_v52 }
 0x50e   : > { %2209 = vmatpush.bf16.msrb.mxu2 %v3877_v22 }
 0x50f   : > { %3410 = vmatmul.msk.bf16.vlgmr.msra.gmra.mxu3 %vm1230_vm3, %v1827_v54  ;;  %3411 = vmatmul.msk.bf16.vlgmr.msra.gmra.mxu0 %vm1230_vm3, %v1866_v55  ;;  %v2237_v54 = vld [vmem:[%s4947_s13 + $0x18] sm:$0xff] }
 0x510   : > { %2035 = vmatpush.bf16.msrb.mxu3 %v1833_v53  ;;  %2107 = vmatpush.bf16.msrb.mxu0 %v3873_v60 }
 0x512   : > { %2210 = vmatpush.bf16.msrb.mxu2 %v3876_v23 }
 0x514   : > { %2133 = vmatpush.bf16.msra.mxu3 %v1833_v53  ;;  %2108 = vmatpush.bf16.msrb.mxu0 %v3872_v61  ;;  %v2238_v53 = vld [vmem:[%s4947_s13 + $0x20] sm:$0xff] }
 0x515   : > { %2261 = vmatpush.msrb.mxu1 %v2238_v53 }
 0x516   : > { %2211 = vmatpush.bf16.msrb.mxu2 %v3875_v24 }
 0x517   : > { %2262 = vmatpush.msrb.mxu1 %v2237_v54 }
 0x518   : > { %2109 = vmatpush.bf16.msrb.mxu0 %v3871_v11 }
 0x519   : > { %2263 = vmatpush.msrb.mxu1 %v2236_v56 }
 0x51a   : > { %2212 = vmatpush.bf16.msrb.mxu2 %v3874_v27 }
 0x51b   : > { %2264 = vmatpush.msrb.mxu1 %v2235_v57 }
 0x51c   : > { %2110 = vmatpush.bf16.msrb.mxu0 %v3870_v13 }
 0x51d   : > { %2265 = vmatpush.msrb.mxu1 %v2234_v58 }
 0x51f   : > { %3492 = vmatmul.msk.bf16.vlgmr.msrb.gmra.mxu3 %vm1230_vm3, %v2024_v2 }
 0x520   : > { %2111 = vmatpush.bf16.msrb.mxu0 %v3869_v14  ;;  %2271 = vmatpush.msrb.mxu3 %v2249_v38 }
 0x522   : > { %2272 = vmatpush.msrb.mxu3 %v2248_v39 }
 0x524   : > { %2112 = vmatpush.bf16.msrb.mxu0 %v3868_v16  ;;  %2273 = vmatpush.msrb.mxu3 %v2247_v40  ;;  %v2309_v16 = vld [vmem:[%s4948_s14 + $0x18] sm:$0xff] }
 0x526   : > { %2274 = vmatpush.msrb.mxu3 %v2246_v41 }
 0x528   : > { %2113 = vmatpush.bf16.msrb.mxu0 %v3867_v18  ;;  %2275 = vmatpush.msrb.mxu3 %v2245_v42  ;;  %v2307_v18 = vld [vmem:[%s4948_s14 + $0x8] sm:$0xff] }
 0x52a   : > { %2276 = vmatpush.msrb.mxu3 %v2244_v43 }
 0x52c   : > { %2114 = vmatpush.bf16.msrb.mxu0 %v3866_v20  ;;  %2277 = vmatpush.msrb.mxu3 %v2243_v46 }
 0x52e   : > { %2278 = vmatpush.msrb.mxu3 %v2242_v47 }
 0x52f   : > { %3541 = vmatmul.msk.bf16.vlgmr.msra.gmra.mxu3 %vm1230_vm3, %v2122_v8 }
 0x530   : > { %2279 = vmatpush.msrb.mxu3 %v2241_v48  ;;  %2325 = vmatpush.msra.mxu0 %v2309_v16  ;;  %v2368_v48 = vld [vmem:[%s4950_s16] sm:$0x1] }
 0x532   : > { %2280 = vmatpush.msrb.mxu3 %v2240_v51  ;;  %2326 = vmatpush.msra.mxu0 %v2308_v17  ;;  %v3897_v51 = vld [vmem:[%s4951_s17 + $0x78] sm:$0xff] }
 0x534   : > { %2281 = vmatpush.msrb.mxu3 %v2239_v52  ;;  %2327 = vmatpush.msra.mxu0 %v2307_v18  ;;  %v3888_v52 = vld [vmem:[%s4951_s17 + $0x30] sm:$0xff] }
 0x536   : > { %2282 = vmatpush.msrb.mxu3 %v2238_v53  ;;  %2328 = vmatpush.msra.mxu0 %v2306_v19  ;;  %v3896_v53 = vld [vmem:[%s4951_s17 + $0x70] sm:$0xff] }
 0x538   : > { %2283 = vmatpush.msrb.mxu3 %v2237_v54  ;;  %v3905_v54 = vld [vmem:[%s4951_s17 + $0xb8] sm:$0xff] }
 0x53a   : > { %2284 = vmatpush.msrb.mxu3 %v2236_v56  ;;  %v3887_v56 = vld [vmem:[%s4951_s17 + $0x28] sm:$0xff] }
 0x53c   : > { %2285 = vmatpush.msrb.mxu3 %v2235_v57  ;;  %v3895_v57 = vld [vmem:[%s4951_s17 + $0x68] sm:$0xff] }
 0x53e   : > { %2286 = vmatpush.msrb.mxu3 %v2234_v58  ;;  %v3903_v58 = vld [vmem:[%s4951_s17 + $0xa8] sm:$0xff] }
 0x58c   : > { %v1879_v25 = vpop.f32.mrf.mxu0 }
 0x58d   : > { %v1883_v26 = vpack.c.bf16 %v1879_v25, %v1879_v25 }
 0x58f   : > { %1957 = vmatmul.bf16.vlgmr.msra.gmra.mxu2 %v1883_v26 }
 0x590   : > { %2491 = vmatpush.bf16.msra.mxu2 %v3897_v51  ;;  %v2777_v51 = vld [vmem:[%s4952_s18 + $0x8] sm:$0xff] }
 0x592   : > { %v1844_v28 = vpop.f32.mrf.mxu3 }
 0x593   : > { %v1848_v29 = vpack.c.bf16 %v1844_v28, %v1844_v28 }
 0x594   : > { %v1881_v30 = vpop.f32.mrf.mxu0  ;;  %2492 = vmatpush.bf16.msra.mxu2 %v3896_v53 }
 0x595   : > { %2018 = vmatmul.bf16.vlgmr.msra.gmra.mxu1 %v1848_v29 }
 0x598   : > { %2493 = vmatpush.bf16.msra.mxu2 %v3895_v57 }
 0x59a   : > { %v1846_v31 = vpop.f32.mrf.mxu3 }
 0x5a2   : > { %v2037_v32 = vpop.f32.mrf.mxu3 }
 0x5a3   : > { %v2041_v33 = vpack.c.bf16 %v2037_v32, %v2037_v32 }
 0x5a5   : > { %2115 = vmatmul.bf16.vlgmr.msrb.gmra.mxu0 %v2041_v33 }
 0x5a6   : > { %2350 = vmatpush.msrb.mxu0 %v2309_v16  ;;  %v3909_v16 = vld [vmem:[%s4951_s17 + $0xd8] sm:$0xff] }
 0x5a8   : > { %2351 = vmatpush.msrb.mxu0 %v2308_v17  ;;  %v3908_v17 = vld [vmem:[%s4951_s17 + $0xd0] sm:$0xff] }
 0x5aa   : > { %v2039_v34 = vpop.f32.mrf.mxu3  ;;  %2352 = vmatpush.msrb.mxu0 %v2307_v18  ;;  %v3907_v18 = vld [vmem:[%s4951_s17 + $0xc8] sm:$0xff] }
 0x5ac   : > { %2353 = vmatpush.msrb.mxu0 %v2306_v19  ;;  %v3906_v19 = vld [vmem:[%s4951_s17 + $0xc0] sm:$0xff] }
 0x5b2   : > { %v2135_v35 = vpop.f32.mrf.mxu3 }
 0x5b3   : > { %v2139_v36 = vpack.c.bf16 %v2135_v35, %v2135_v35 }
 0x5b5   : > { %2213 = vmatmul.bf16.vlgmr.msrb.gmra.mxu2 %v2139_v36 }
 0x5ba   : > { %v2137_v37 = vpop.f32.mrf.mxu3 }
 0x5bb   : > { %v2333_v37 = vld [vmem:[%s4949_s15] sm:$0x1] }
 0x612   : > { %v1958_v44 = vpop.f32.mrf.mxu2  ;;  %v2019_v45 = vpop.f32.mrf.mxu1 }
 0x613   : > { %v2020_v60 = vadd.f32 %v2019_v45, %v1958_v44 }
 0x61a   : > { %v2021_v49 = vpop.f32.mrf.mxu1  ;;  %v1960_v50 = vpop.f32.mrf.mxu2 }
 0x61b   : > { %v3593_v49 = vld [vmem:[%s4950_s16 + $0x1] sm:$0x1]  ;;  %v3889_v50 = vld [vmem:[%s4951_s17 + $0x38] sm:$0xff] }
 0x61c   : > { %2552 = vmatpush.bf16.msra.mxu3 %v3889_v50  ;;  %v2778_v50 = vld [vmem:[%s4952_s18 + $0x10] sm:$0xff] }
 0x620   : > { %2553 = vmatpush.bf16.msra.mxu3 %v3888_v52  ;;  %v2776_v52 = vld [vmem:[%s4952_s18] sm:$0xff] }
 0x622   : > { %v2116_v55 = vpop.f32.mrf.mxu0 }
 0x623   : > { %v2120_v61 = vadd.f32 %v2116_v55, %v2020_v60  ;;  %v3904_v55 = vld [vmem:[%s4951_s17 + $0xb0] sm:$0xff]  ;;  %v3894_v60 = vld [vmem:[%s4951_s17 + $0x60] sm:$0xff] }
 0x624   : > { %2554 = vmatpush.bf16.msra.mxu3 %v3887_v56  ;;  %2494 = vmatpush.bf16.msra.mxu2 %v3894_v60 }
 0x62a   : > { %v2118_v59 = vpop.f32.mrf.mxu0 }
 0x62b   : > { %v3886_v59 = vld [vmem:[%s4951_s17 + $0x20] sm:$0xff] }
 0x62c   : > { %2555 = vmatpush.bf16.msra.mxu3 %v3886_v59 }
 0x638   : > { %v2214_v62 = vpop.f32.mrf.mxu2 }
 0x639   : > { %v2218_v63 = vadd.f32 %v2214_v62, %v2120_v61  ;;  %v3675_v61 = vld [vmem:[%s4950_s16 + $0x2] sm:$0x1]  ;;  %v3885_v62 = vld [vmem:[%s4951_s17 + $0x18] sm:$0xff] }
 0x63a   : > { %2556 = vmatpush.bf16.msra.mxu3 %v3885_v62 }
 0x63b   : > { %v2219_v0 = vsel %vm1831_vm9, %v2218_v63, 0.0  ;;  %v2226_v1 = vmul.f32 %v2218_v63, %v2218_v63 }
 0x63c   : > { %v2220_v2 = vrot.slane %v2219_v0, 4 }
 0x63d   : > { %v2227_v3 = vsel %vm1831_vm9, %v2226_v1, 0.0  ;;  %v3892_v1 = vld [vmem:[%s4951_s17 + $0x50] sm:$0xff] }
 0x63e   : > { %v2221_v4 = vadd.f32 %v2220_v2, %v2219_v0  ;;  %v2228_v5 = vrot.slane %v2227_v3, 4  ;;  %v3884_v0 = vld [vmem:[%s4951_s17 + $0x10] sm:$0xff]  ;;  %v3883_v2 = vld [vmem:[%s4951_s17 + $0x8] sm:$0xff] }
 0x63f   : > { %2557 = vmatpush.bf16.msra.mxu3 %v3884_v0 }
 0x640   : > { %v2222_v6 = vrot.slane %v2221_v4, 2  ;;  %v2229_v7 = vadd.f32 %v2228_v5, %v2227_v3  ;;  %v2216_v8 = vpop.f32.mrf.mxu2  ;;  %v3891_v3 = vld [vmem:[%s4951_s17 + $0x48] sm:$0xff]  ;;  %v3882_v5 = vld [vmem:[%s4951_s17] sm:$0xff] }
 0x641   : > { %v3901_v8 = vld [vmem:[%s4951_s17 + $0x98] sm:$0xff] }
 0x642   : > { %v2223_v9 = vadd.f32 %v2222_v6, %v2221_v4  ;;  %v2230_v10 = vrot.slane %v2229_v7, 2  ;;  %v3725_v4 = vld [vmem:[%s4950_s16 + $0x3] sm:$0x1] }
 0x643   : > { %2558 = vmatpush.bf16.msra.mxu3 %v3883_v2  ;;  %v3902_v6 = vld [vmem:[%s4951_s17 + $0xa0] sm:$0xff] }
 0x644   : > { %v2224_v11 = vrot.slane %v2223_v9, 1  ;;  %v2231_v12 = vadd.f32 %v2230_v10, %v2229_v7  ;;  %v3890_v7 = vld [vmem:[%s4951_s17 + $0x40] sm:$0xff]  ;;  %v3900_v10 = vld [vmem:[%s4951_s17 + $0x90] sm:$0xff] }
 0x646   : > { %v2225_v13 = vadd.f32 %v2224_v11, %v2223_v9  ;;  %v2232_v14 = vrot.slane %v2231_v12, 1  ;;  %v3913_v9 = vld [vmem:[%s4951_s17 + $0xf8] sm:$0xff]  ;;  %v3912_v11 = vld [vmem:[%s4951_s17 + $0xf0] sm:$0xff] }
 0x647   : > { %2559 = vmatpush.bf16.msra.mxu3 %v3882_v5 }
 0x648   : > { %2266 = vmatmul.f32.vlgmr.msrb.gmra.mxu1 %v2225_v13  ;;  %v2233_v15 = vadd.f32 %v2232_v14, %v2231_v12  ;;  %v3899_v12 = vld [vmem:[%s4951_s17 + $0x88] sm:$0xff]  ;;  %v3898_v14 = vld [vmem:[%s4951_s17 + $0x80] sm:$0xff] }
 0x649   : > { %v3911_v13 = vld [vmem:[%s4951_s17 + $0xe8] sm:$0xff] }
 0x64a   : > { %2287 = vmatmul.f32.vlgmr.msrb.gmra.mxu3 %v2233_v15  ;;  %v3910_v15 = vld [vmem:[%s4951_s17 + $0xe0] sm:$0xff] }
 0x6c5   : > { %v2267_v20 = vpop.f32.mrf.mxu1 }
 0x6c6   : > { %v2270_v21 = vmul.f32 0.0625, %v2267_v20 }
 0x6c8   : > { %v2292_v23 = vmul.f32 %v2270_v21, %v2270_v21 }
 0x6cd   : > { %v2288_v22 = vpop.f32.mrf.mxu3 }
 0x6ce   : > { %v2291_v24 = vmul.f32 0.0625, %v2288_v22 }
 0x6d0   : > { %v2293_v25 = vsub.f32 %v2291_v24, %v2292_v23 }
 0x6d2   : > { %v2294_v26 = vmax.f32 %v2293_v25, 0.0 }
 0x6d4   : > { %v2295_v27 = vadd.f32 1e-05, %v2294_v26 }
 0x6d6   : > { %3959 = vrsqrt.f32 %v2295_v27  ;;  %vm2302_vm11 = vweird.f32 %v2295_v27 }
 0x6dc   : > { %v3960_v28 = vpop.eup %3959 }
 0x6dd   : > { %v2297_v29 = vmul.f32 %v3960_v28, %v2295_v27  ;;  %vm2303_vm10 = vweird.f32 %v3960_v28 }
 0x6de   : > { %vm2304_vm12 = vmor %vm2302_vm11, %vm2303_vm10 }
 0x6df   : > { %v2298_v30 = vmul.f32 %v3960_v28, %v2297_v29 }
 0x6e1   : > { %v2299_v31 = vmul.f32 0.5, %v2298_v30 }
 0x6e3   : > { %v2300_v32 = vsub.f32 1.5, %v2299_v31 }
 0x6e5   : > { %v2301_v33 = vmul.f32 %v3960_v28, %v2300_v32  ;;  %v2791_v32 = vld [vmem:[%s4952_s18 + $0x78] sm:$0xff] }
 0x6e6   : > { %2792 = vmatpush.msrb.mxu3 %v2791_v32 }
 0x6e7   : > { %v2305_v34 = vsel %vm2304_vm12, %v3960_v28, %v2301_v33  ;;  %v2790_v33 = vld [vmem:[%s4952_s18 + $0x70] sm:$0xff] }
 0x6e8   : > { %3590 = vmatmul.msk.f32.vlgmr.msra.gmra.mxu0 %vm725_vm0, %v2305_v34  ;;  %v2334_v35 = vmul.f32 %v2305_v34, %v2270_v21  ;;  %v2789_v34 = vld [vmem:[%s4952_s18 + $0x68] sm:$0xff]  ;;  %2793 = vmatpush.msrb.mxu3 %v2790_v33 }
 0x6ea   : > { %2794 = vmatpush.msrb.mxu3 %v2789_v34 }
 0x6f0   : > { %3591 = vmatmul.msk.f32.vlgmr.msrb.gmra.mxu0 %vm725_vm0, %v2334_v35  ;;  %v2788_v35 = vld [vmem:[%s4952_s18 + $0x60] sm:$0xff] }
 0x6f1   : > { %2795 = vmatpush.msrb.mxu3 %v2788_v35 }
 0x765   : > { %v2330_v36 = vpop.f32.mrf.mxu0 }
 0x766   : > { %v2359_v38 = vperm.slane %v2330_v36, 0  ;;  %v2787_v36 = vld [vmem:[%s4952_s18 + $0x58] sm:$0xff] }
 0x767   : > { %2796 = vmatpush.msrb.mxu3 %v2787_v36 }
 0x768   : > { %v2360_v41 = vmul.f32 %v2359_v38, %v2218_v63  ;;  %v3893_v63 = vld [vmem:[%s4951_s17 + $0x58] sm:$0xff]  ;;  %v2785_v38 = vld [vmem:[%s4952_s18 + $0x48] sm:$0xff] }
 0x769   : > { %2495 = vmatpush.bf16.msra.mxu2 %v3893_v63 }
 0x76d   : > { %v2355_v39 = vpop.f32.mrf.mxu0  ;;  %2496 = vmatpush.bf16.msra.mxu2 %v3892_v1 }
 0x76e   : > { %v2358_v40 = vsub.f32 %v2333_v37, %v2355_v39  ;;  %v2786_v37 = vld [vmem:[%s4952_s18 + $0x50] sm:$0xff]  ;;  %v2784_v39 = vld [vmem:[%s4952_s18 + $0x40] sm:$0xff] }
 0x76f   : > { %2797 = vmatpush.msrb.mxu3 %v2786_v37 }
 0x770   : > { %v2362_v42 = vperm.slane %v2358_v40, 0 }
 0x771   : > { %2497 = vmatpush.bf16.msra.mxu2 %v3891_v3  ;;  %2798 = vmatpush.msrb.mxu3 %v2785_v38 }
 0x772   : > { %v2364_v43 = vadd.f32 %v2362_v42, %v2360_v41  ;;  %v2783_v42 = vld [vmem:[%s4952_s18 + $0x38] sm:$0xff] }
 0x773   : > { %2799 = vmatpush.msrb.mxu3 %v2784_v39 }
 0x774   : > { %v2365_v44 = vmul.f32 0.01, %v2364_v43 }
 0x775   : > { %2498 = vmatpush.bf16.msra.mxu2 %v3890_v7  ;;  %2800 = vmatpush.msrb.mxu3 %v2783_v42 }
 0x776   : > { %v2366_v45 = vmax.f32 %v2364_v43, %v2365_v44  ;;  %v2782_v43 = vld [vmem:[%s4952_s18 + $0x30] sm:$0xff]  ;;  %v2781_v44 = vld [vmem:[%s4952_s18 + $0x28] sm:$0xff] }
 0x777   : > { %2801 = vmatpush.msrb.mxu3 %v2782_v43 }
 0x778   : > { %v2367_v46 = vpack.c.bf16 %v2366_v45, %v2366_v45  ;;  %v2780_v45 = vld [vmem:[%s4952_s18 + $0x20] sm:$0xff] }
 0x779   : > { %2747 = vmatpush.bf16.msrb.mxu2 %v3913_v9  ;;  %2802 = vmatpush.msrb.mxu3 %v2781_v44 }
 0x77a   : > { %v2375_v47 = vsel %vm2373_vm13, %v2367_v46, 0 }
 0x77b   : > { %2384 = vmatpush.bf16.msra.mxu0 %v2375_v47  ;;  %2419 = vmatpush.bf16.msra.mxu1 %v2375_v47 }
 0x77c   : > { %2803 = vmatpush.msrb.mxu3 %v2780_v45 }
 0x77d   : > { %2748 = vmatpush.bf16.msrb.mxu2 %v3912_v11  ;;  %v2854_v11 = vld [vmem:[%s4953_s19 + $0x30] sm:$0xff] }
 0x77e   : > { %3592 = vmatmul.msk.bf16.vlgmr.msra.gmra.mxu0 %vm2369_vm14, %v2368_v48  ;;  %3594 = vmatmul.msk.bf16.vlgmr.msra.gmra.mxu1 %vm2369_vm14, %v3593_v49  ;;  %v2779_v48 = vld [vmem:[%s4952_s18 + $0x18] sm:$0xff] }
 0x77f   : > { %2577 = vmatpush.bf16.msrb.mxu0 %v2375_v47  ;;  %2649 = vmatpush.bf16.msrb.mxu1 %v3905_v54 }
 0x780   : > { %2804 = vmatpush.msrb.mxu3 %v2779_v48 }
 0x781   : > { %2749 = vmatpush.bf16.msrb.mxu2 %v3911_v13  ;;  %v2852_v13 = vld [vmem:[%s4953_s19 + $0x20] sm:$0xff] }
 0x782   : > { %2805 = vmatpush.msrb.mxu3 %v2778_v50 }
 0x783   : > { %2675 = vmatpush.bf16.msra.mxu0 %v2375_v47  ;;  %2650 = vmatpush.bf16.msrb.mxu1 %v3904_v55 }
 0x784   : > { %2806 = vmatpush.msrb.mxu3 %v2777_v51 }
 0x785   : > { %2750 = vmatpush.bf16.msrb.mxu2 %v3910_v15  ;;  %v2850_v15 = vld [vmem:[%s4953_s19 + $0x10] sm:$0xff] }
 0x786   : > { %2807 = vmatpush.msrb.mxu3 %v2776_v52 }
 0x787   : > { %2651 = vmatpush.bf16.msrb.mxu1 %v3903_v58 }
 0x789   : > { %2751 = vmatpush.bf16.msrb.mxu2 %v3909_v16  ;;  %v2849_v16 = vld [vmem:[%s4953_s19 + $0x8] sm:$0xff] }
 0x78b   : > { %2652 = vmatpush.bf16.msrb.mxu1 %v3902_v6 }
 0x78d   : > { %2752 = vmatpush.bf16.msrb.mxu2 %v3908_v17  ;;  %v2848_v17 = vld [vmem:[%s4953_s19] sm:$0xff] }
 0x78e   : > { %3676 = vmatmul.msk.bf16.vlgmr.msrb.gmra.mxu0 %vm2369_vm14, %v3675_v61 }
 0x78f   : > { %2653 = vmatpush.bf16.msrb.mxu1 %v3901_v8  ;;  %2813 = vmatpush.msrb.mxu0 %v2791_v32 }
 0x791   : > { %2753 = vmatpush.bf16.msrb.mxu2 %v3907_v18  ;;  %2814 = vmatpush.msrb.mxu0 %v2790_v33 }
 0x793   : > { %2654 = vmatpush.bf16.msrb.mxu1 %v3900_v10  ;;  %2815 = vmatpush.msrb.mxu0 %v2789_v34  ;;  %v2855_v10 = vld [vmem:[%s4953_s19 + $0x38] sm:$0xff] }
 0x795   : > { %2754 = vmatpush.bf16.msrb.mxu2 %v3906_v19  ;;  %2816 = vmatpush.msrb.mxu0 %v2788_v35  ;;  %v2880_v35 = vld [vmem:[%s4954_s20] sm:$0x1] }
 0x797   : > { %2655 = vmatpush.bf16.msrb.mxu1 %v3899_v12  ;;  %2817 = vmatpush.msrb.mxu0 %v2787_v36  ;;  %v2853_v12 = vld [vmem:[%s4953_s19 + $0x28] sm:$0xff] }
 0x799   : > { %2818 = vmatpush.msrb.mxu0 %v2786_v37 }
 0x79b   : > { %2656 = vmatpush.bf16.msrb.mxu1 %v3898_v14  ;;  %2819 = vmatpush.msrb.mxu0 %v2785_v38  ;;  %v2851_v14 = vld [vmem:[%s4953_s19 + $0x18] sm:$0xff] }
 0x79d   : > { %2820 = vmatpush.msrb.mxu0 %v2784_v39 }
 0x79e   : > { %3726 = vmatmul.msk.bf16.vlgmr.msra.gmra.mxu0 %vm2369_vm14, %v3725_v4 }
 0x79f   : > { %2821 = vmatpush.msrb.mxu0 %v2783_v42  ;;  %2868 = vmatpush.msra.mxu1 %v2855_v10 }
 0x7a1   : > { %2822 = vmatpush.msrb.mxu0 %v2782_v43  ;;  %2869 = vmatpush.msra.mxu1 %v2854_v11 }
 0x7a3   : > { %2823 = vmatpush.msrb.mxu0 %v2781_v44  ;;  %2870 = vmatpush.msra.mxu1 %v2853_v12 }
 0x7a5   : > { %2824 = vmatpush.msrb.mxu0 %v2780_v45  ;;  %2871 = vmatpush.msra.mxu1 %v2852_v13 }
 0x7a7   : > { %2825 = vmatpush.msrb.mxu0 %v2779_v48  ;;  %2872 = vmatpush.msra.mxu1 %v2851_v14 }
 0x7a9   : > { %2826 = vmatpush.msrb.mxu0 %v2778_v50  ;;  %2873 = vmatpush.msra.mxu1 %v2850_v15 }
 0x7ab   : > { %2827 = vmatpush.msrb.mxu0 %v2777_v51  ;;  %2874 = vmatpush.msra.mxu1 %v2849_v16 }
 0x7ad   : > { %2828 = vmatpush.msrb.mxu0 %v2776_v52  ;;  %2875 = vmatpush.msra.mxu1 %v2848_v17 }
 0x7fb   : > { %v2386_v20 = vpop.f32.mrf.mxu0  ;;  %v2421_v21 = vpop.f32.mrf.mxu1 }
 0x7fc   : > { %v2390_v22 = vpack.c.bf16 %v2386_v20, %v2386_v20  ;;  %v2425_v23 = vpack.c.bf16 %v2421_v21, %v2421_v21 }
 0x7fe   : > { %2560 = vmatmul.bf16.vlgmr.msra.gmra.mxu3 %v2390_v22  ;;  %2499 = vmatmul.bf16.vlgmr.msra.gmra.mxu2 %v2425_v23 }
 0x803   : > { %v2388_v24 = vpop.f32.mrf.mxu0  ;;  %v2423_v25 = vpop.f32.mrf.mxu1 }
 0x80b   : > { %v2579_v26 = vpop.f32.mrf.mxu0 }
 0x80c   : > { %v2583_v27 = vpack.c.bf16 %v2579_v26, %v2579_v26 }
 0x80e   : > { %2657 = vmatmul.bf16.vlgmr.msrb.gmra.mxu1 %v2583_v27 }
 0x80f   : > { %2893 = vmatpush.msrb.mxu1 %v2855_v10 }
 0x811   : > { %2894 = vmatpush.msrb.mxu1 %v2854_v11 }
 0x813   : > { %v2581_v28 = vpop.f32.mrf.mxu0  ;;  %2895 = vmatpush.msrb.mxu1 %v2853_v12 }
 0x815   : > { %2896 = vmatpush.msrb.mxu1 %v2852_v13 }
 0x817   : > { %2897 = vmatpush.msrb.mxu1 %v2851_v14 }
 0x819   : > { %2898 = vmatpush.msrb.mxu1 %v2850_v15 }
 0x81b   : > { %v2677_v29 = vpop.f32.mrf.mxu0  ;;  %2899 = vmatpush.msrb.mxu1 %v2849_v16 }
 0x81c   : > { %v2681_v30 = vpack.c.bf16 %v2677_v29, %v2677_v29 }
 0x81d   : > { %2900 = vmatpush.msrb.mxu1 %v2848_v17 }
 0x81e   : > { %2755 = vmatmul.bf16.vlgmr.msrb.gmra.mxu2 %v2681_v30 }
 0x823   : > { %v2679_v31 = vpop.f32.mrf.mxu0 }
 0x881   : > { %v2561_v40 = vpop.f32.mrf.mxu3  ;;  %v2500_v41 = vpop.f32.mrf.mxu2 }
 0x882   : > { %v2562_v54 = vadd.f32 %v2561_v40, %v2500_v41 }
 0x889   : > { %v2563_v46 = vpop.f32.mrf.mxu3  ;;  %v2502_v47 = vpop.f32.mrf.mxu2 }
 0x88b   : > { %v2658_v49 = vpop.f32.mrf.mxu1 }
 0x88c   : > { %v2662_v55 = vadd.f32 %v2658_v49, %v2562_v54 }
 0x893   : > { %v2660_v53 = vpop.f32.mrf.mxu1 }
 0x8a1   : > { %v2756_v56 = vpop.f32.mrf.mxu2 }
 0x8a2   : > { %v4892_v57 = vadd.f32 %v2756_v56, %v2662_v55 }
 0x8a4   : > { %v2761_v58 = vsel %vm2373_vm13, %v4892_v57, 0.0  ;;  %v2768_v59 = vmul.f32 %v4892_v57, %v4892_v57 }
 0x8a5   : > { %v2762_v60 = vrot.slane %v2761_v58, 4 }
 0x8a6   : > { %v2769_v61 = vsel %vm2373_vm13, %v2768_v59, 0.0 }
 0x8a7   : > { %v2763_v62 = vadd.f32 %v2762_v60, %v2761_v58  ;;  %v2770_v63 = vrot.slane %v2769_v61, 4 }
 0x8a9   : > { %v2764_v0 = vrot.slane %v2763_v62, 2  ;;  %v2771_v1 = vadd.f32 %v2770_v63, %v2769_v61  ;;  %v2758_v2 = vpop.f32.mrf.mxu2 }
 0x8ab   : > { %v2765_v3 = vadd.f32 %v2764_v0, %v2763_v62  ;;  %v2772_v4 = vrot.slane %v2771_v1, 2 }
 0x8ad   : > { %v2766_v5 = vrot.slane %v2765_v3, 1  ;;  %v2773_v6 = vadd.f32 %v2772_v4, %v2771_v1 }
 0x8af   : > { %v2767_v7 = vadd.f32 %v2766_v5, %v2765_v3  ;;  %v2774_v8 = vrot.slane %v2773_v6, 1 }
 0x8b1   : > { %2808 = vmatmul.f32.vlgmr.msrb.gmra.mxu3 %v2767_v7  ;;  %v2775_v9 = vadd.f32 %v2774_v8, %v2773_v6 }
 0x8b3   : > { %2829 = vmatmul.f32.vlgmr.msrb.gmra.mxu0 %v2775_v9 }
 0x930   : > { %v2830_v18 = vpop.f32.mrf.mxu0 }
 0x931   : > { %v2833_v21 = vmul.f32 0.25, %v2830_v18 }
 0x934   : > { %v2809_v19 = vpop.f32.mrf.mxu3 }
 0x935   : > { %v2812_v20 = vmul.f32 0.25, %v2809_v19 }
 0x937   : > { %v2834_v22 = vmul.f32 %v2812_v20, %v2812_v20 }
 0x939   : > { %v2835_v23 = vsub.f32 %v2833_v21, %v2834_v22 }
 0x93b   : > { %v2836_v24 = vmax.f32 %v2835_v23, 0.0 }
 0x93d   : > { %v2837_v25 = vadd.f32 1e-05, %v2836_v24 }
 0x93f   : > { %3961 = vrsqrt.f32 %v2837_v25  ;;  %vm2844_vm0 = vweird.f32 %v2837_v25 }
 0x945   : > { %v3962_v26 = vpop.eup %3961 }
 0x946   : > { %v2839_v27 = vmul.f32 %v3962_v26, %v2837_v25  ;;  %vm2845_vm15 = vweird.f32 %v3962_v26 }
 0x947   : > { %vm2846_vm2 = vmor %vm2844_vm0, %vm2845_vm15 }
 0x948   : > { %v2840_v28 = vmul.f32 %v3962_v26, %v2839_v27 }
 0x94a   : > { %v2841_v29 = vmul.f32 0.5, %v2840_v28 }
 0x94c   : > { %v2842_v30 = vsub.f32 1.5, %v2841_v29 }
 0x94e   : > { %v2843_v31 = vmul.f32 %v3962_v26, %v2842_v30 }
 0x950   : > { %v2847_v32 = vsel %vm2846_vm2, %v3962_v26, %v2843_v31 }
 0x951   : > { %3775 = vmatmul.msk.f32.vlgmr.msra.gmra.mxu1 %vm2856_vm1, %v2847_v32  ;;  %v2881_v33 = vmul.f32 %v2847_v32, %v2812_v20 }
 0x959   : > { %3776 = vmatmul.msk.f32.vlgmr.msrb.gmra.mxu1 %vm2856_vm1, %v2881_v33 }
 0x9ce   : > { %v2877_v34 = vpop.f32.mrf.mxu1 }
 0x9cf   : > { %v2906_v36 = vperm.slane %v2877_v34, 0 }
 0x9d1   : > { %v2907_v39 = vmul.f32 %v2906_v36, %v4892_v57 }
 0x9d6   : > { %v2902_v37 = vpop.f32.mrf.mxu1 }
 0x9d7   : > { %v2905_v38 = vsub.f32 %v2880_v35, %v2902_v37 }
 0x9d9   : > { %v2909_v40 = vperm.slane %v2905_v38, 0 }
 0x9db   : > { %v2911_v41 = vadd.f32 %v2909_v40, %v2907_v39 }
 0x9dd   : > { %v2912_v42 = vmul.f32 0.01, %v2911_v41 }
 0x9df   : > { %v2913_v43 = vmax.f32 %v2911_v41, %v2912_v42 }
 0x9e1   : > { %2914 = vst [vmem:[%s700_s22] sm:$0x3] %v2913_v43 }
 0x9e2 PF: > { %s33_s2 = sadd.s32 1, %s4067_s2  }
 0x9e3   : > { %p30_p7 = scmp.ge.s32.totalorder %s33_s2, 4  }
 0x9e5   :  { %32 = sbr.rel (!%p30_p7) target bundleno = 10 (0xa), region = 171 }
 0x9ea   :  { %2934 = vsyncpa [#allocation3], 1 }
 0x9eb   :  { %2936 = vsyncpa [#allocation3 + $0x1], 1 }
 0x9ec   :  { %2937 = vsyncpa [#allocation5], 1 }

</bundles_post_ra>
